<compile_context>
chip_gen: v6e
topology: v6e:2x2x1
jax: 0.10.0
libtpu: 0.0.40
codegen_flags: <defaults>
</compile_context>

<pallas_src>
import jax
import jax.numpy as jnp
from jax import lax
from jax.experimental import pallas as pl
from jax.experimental.pallas import tpu as pltpu

NUM_FEATURES = 16       # 8 random-embedding dims + 8 color-encoding dims
DIM1 = 64
DIM2 = 32
Q = 8                   # softmax is taken over the first 8 feature columns
NUM_BLOCKS = 5
LAYERS_PER_BLOCK = 3
NUM_LAYERS = NUM_BLOCKS * LAYERS_PER_BLOCK
F_PAD = 64              # uniform padded channel width for all layers


# --------------------------------------------------------------------------
# Fused Pallas kernel: all 15 GCN layers, intermediates never leave VMEM
# --------------------------------------------------------------------------
def _fused_gcn_kernel(a_ref, x_ref, w_ref, b_ref, o_ref):
    """One graph per grid step.

    a_ref: (1, N, N)   normalized adjacency for this graph
    x_ref: (1, N, 64)  node features, zero-padded from 16 -> 64 channels
    w_ref: (15, 64, 64) stacked zero-padded layer weights (resident across grid)
    b_ref: (15, 1, 64)  stacked zero-padded layer biases  (resident across grid)
    o_ref: (1, N, Q)    softmax over the first Q columns of the last layer
    """
    a = a_ref[0]                               # (N, N)
    h = x_ref[0]                               # (N, 64); real data in cols [:16]

    # Hoisted column mask (built once; JAX does not CSE broadcast_in_dim).
    col = lax.broadcasted_iota(jnp.int32, h.shape, 1)
    keep_q = col < Q                           # (N, 64)

    layer = 0
    for blk in range(NUM_BLOCKS):
        for li in range(LAYERS_PER_BLOCK):
            w = w_ref[layer]                   # (64, 64)  static slice
            b = b_ref[layer]                   # (1, 64)
            layer += 1
            hw = jnp.dot(h, w, preferred_element_type=jnp.float32)
            h = jnp.dot(a, hw, preferred_element_type=jnp.float32) + b
            if li < LAYERS_PER_BLOCK - 1:
                h = jnp.maximum(h, 0.0)        # relu

        # Partial softmax over the first Q columns.
        hq = h[:, :Q]
        m = jnp.max(hq, axis=1, keepdims=True)
        if blk < NUM_BLOCKS - 1:
            # Single full-width exp per epilogue; its [:, :Q] slice gives the
            # row sum.  Discarded lanes may saturate but are masked out by the
            # jnp.where (benign; see review note).
            e = jnp.exp(h - m)
            inv = pl.reciprocal(jnp.sum(e[:, :Q], axis=1, keepdims=True),
                                approx=True)
            h = jnp.where(keep_q, e * inv, h)  # cols [Q:16] pass through,
                                               # cols [16:64] remain zero
        else:
            # Final block: exact reciprocal, only the (N, Q) slab is stored.
            e_q = jnp.exp(hq - m)
            o_ref[0] = e_q / jnp.sum(e_q, axis=1, keepdims=True)


# --------------------------------------------------------------------------
# Wrapper: pack params, pad features, batch graphs on a parallel grid axis
# --------------------------------------------------------------------------
def _pack_params(params):
    """Zero-pad every (W, b) to the uniform 64-channel layout and stack."""
    ws, bs = [], []
    for block in params:
        for (w, b) in block:
            f_in, f_out = w.shape
            wp = jnp.zeros((F_PAD, F_PAD), jnp.float32).at[:f_in, :f_out].set(w)
            bp = jnp.zeros((1, F_PAD), jnp.float32).at[0, :f_out].set(b)
            ws.append(wp)
            bs.append(bp)
    return jnp.stack(ws), jnp.stack(bs)        # (15, 64, 64), (15, 1, 64)


def _cost_estimate(g, n):
    flops_per_layer = 2 * n * F_PAD * F_PAD + 2 * n * n * F_PAD
    flops = g * NUM_LAYERS * flops_per_layer
    transcendentals = g * NUM_BLOCKS * n * F_PAD
    bytes_accessed = 4 * (g * n * n + g * n * F_PAD
                          + NUM_LAYERS * F_PAD * F_PAD
                          + NUM_LAYERS * F_PAD
                          + g * n * Q)
    return pl.CostEstimate(flops=flops, transcendentals=transcendentals,
                           bytes_accessed=bytes_accessed)


def _model2_forward_batched(params, x, a_hat):
    """x: (G, N, 16), a_hat: (G, N, N) -> (G, N, Q)."""
    g, n, f = x.shape
    assert f == NUM_FEATURES
    w_stack, b_stack = _pack_params(params)
    x_pad = jnp.pad(x, ((0, 0), (0, 0), (0, F_PAD - f)))

    return pl.pallas_call(
        _fused_gcn_kernel,
        out_shape=jax.ShapeDtypeStruct((g, n, Q), jnp.float32),
        grid=(g,),
        in_specs=[
            pl.BlockSpec((1, n, n), lambda gi: (gi, 0, 0)),          # a_hat
            pl.BlockSpec((1, n, F_PAD), lambda gi: (gi, 0, 0)),      # x (padded)
            pl.BlockSpec((NUM_LAYERS, F_PAD, F_PAD), lambda gi: (0, 0, 0)),
            pl.BlockSpec((NUM_LAYERS, 1, F_PAD), lambda gi: (0, 0, 0)),
        ],
        out_specs=pl.BlockSpec((1, n, Q), lambda gi: (gi, 0, 0)),
        compiler_params=pltpu.CompilerParams(
            dimension_semantics=("parallel",)),
        cost_estimate=_cost_estimate(g, n),
    )(a_hat, x_pad, w_stack, b_stack)


model2_forward_batched = jax.jit(_model2_forward_batched)


def model2_forward(params, x, a_hat):
    """Single-graph convenience wrapper."""
    return model2_forward_batched(params, x[None], a_hat[None])[0]


# --------------------------------------------------------------------------
# Parameter / graph setup (plain-JAX glue)
# --------------------------------------------------------------------------
def glorot(key, f_in, f_out):
    limit = (6.0 / (f_in + f_out)) ** 0.5
    return jax.random.uniform(key, (f_in, f_out), jnp.float32, -limit, limit)


def init_params(key):
    """15 GCNConv layers: 5 blocks of (F->64, 64->32, 32->F). Bias = 0."""
    dims = [(NUM_FEATURES, DIM1), (DIM1, DIM2), (DIM2, NUM_FEATURES)]
    params = []
    keys = jax.random.split(key, NUM_LAYERS)
    k_iter = iter(keys)
    for _block in range(NUM_BLOCKS):
        block_params = []
        for f_in, f_out in dims:
            w = glorot(next(k_iter), f_in, f_out)
            b = jnp.zeros((f_out,), jnp.float32)
            block_params.append((w, b))
        params.append(block_params)
    return params


def build_a_hat(edge_index, num_nodes):
    """Dense GCN propagation matrix: D^-1/2 (A + I) D^-1/2 (edge weights 1)."""
    src, dst = edge_index
    a = jnp.zeros((num_nodes, num_nodes), jnp.float32)
    a = a.at[dst, src].add(1.0)                     # message src -> dst (PyG convention)
    a = a + jnp.eye(num_nodes, dtype=jnp.float32)   # add self-loops
    deg = jnp.sum(a, axis=1)
    d_inv_sqrt = jnp.where(deg > 0, 1.0 / jnp.sqrt(deg), 0.0)
    return d_inv_sqrt[:, None] * a * d_inv_sqrt[None, :]


# Pure-JAX reference for a correctness check.
def model2_forward_ref(params, x, a_hat):
    def layer(h, w, b):
        return a_hat @ (h @ w) + b

    h = x
    for block in params:
        (w1, b1), (w2, b2), (w3, b3) = block
        h = jnp.maximum(layer(h, w1, b1), 0.0)
        h = jnp.maximum(layer(h, w2, b2), 0.0)
        h = layer(h, w3, b3)
        s = jax.nn.softmax(h[:, :Q], axis=1)
        h = jnp.concatenate([s, h[:, Q:]], axis=1)
    return h[:, :Q]


# --------------------------------------------------------------------------
if __name__ == "__main__":
    key = jax.random.PRNGKey(0)
    k_x0, k_x1 = jax.random.split(key)

    num_nodes = 8
    num_graphs = 2

    # Node features: first 8 dims random embedding, last 8 dims a fixed
    # "use k colors" encoding, per the module docstring.
    color_enc_5 = jnp.tile(
        jnp.array([1, 1, 1, 1, 1, 0, 0, 0], jnp.float32)[None, :], (num_nodes, 1))
    color_enc_4 = jnp.tile(
        jnp.array([1, 1, 1, 1, 0, 0, 0, 0], jnp.float32)[None, :], (num_nodes, 1))
    x0 = jnp.concatenate(
        [jax.random.normal(k_x0, (num_nodes, Q), jnp.float32), color_enc_5], axis=1)
    x1 = jnp.concatenate(
        [jax.random.normal(k_x1, (num_nodes, Q), jnp.float32), color_enc_4], axis=1)
    x = jnp.stack([x0, x1])                          # (2, 8, 16)

    # Two small undirected graphs: rings with different chords (both directions).
    def make_edge_index(chords):
        edges = [(i, (i + 1) % num_nodes) for i in range(num_nodes)] + chords
        src = [s for s, d in edges] + [d for s, d in edges]
        dst = [d for s, d in edges] + [s for s, d in edges]
        return jnp.array([src, dst], dtype=jnp.int32)

    a_hat = jnp.stack([
        build_a_hat(make_edge_index([(0, 4), (2, 6)]), num_nodes),
        build_a_hat(make_edge_index([(1, 5), (3, 7)]), num_nodes),
    ])                                               # (2, 8, 8)

    params = init_params(jax.random.PRNGKey(42))

    out = jax.block_until_ready(model2_forward_batched(params, x, a_hat))
    assert out.shape == (num_graphs, num_nodes, Q)

    for g in range(num_graphs):
        ref = model2_forward_ref(params, x[g], a_hat[g])
        # Tolerance accommodates the EUP approximate reciprocal (~2^-12 rel.)
        # used in the 4 intermediate softmax epilogues (the final block uses
        # exact division); real semantic bugs would be >> 1e-2.
        assert jnp.allclose(out[g], ref, rtol=2e-3, atol=2e-3), (
            f"mismatch vs JAX reference on graph {g}")

    # Single-graph convenience path exercised too.
    out0 = jax.block_until_ready(model2_forward(params, x[0], a_hat[0]))
    assert jnp.allclose(out0, out[0], rtol=1e-6, atol=1e-6)

    print("KERNEL_OK")
</pallas_src>

<mosaic_0001>
module attributes {stable_mosaic.version = 11 : i64} {
  func.func @_fused_gcn_kernel(%arg0: i32, %arg1: memref<1x8x8xf32, #tpu.memory_space<vmem>>, %arg2: memref<1x8x64xf32, #tpu.memory_space<vmem>>, %arg3: memref<15x64x64xf32, #tpu.memory_space<vmem>>, %arg4: memref<15x1x64xf32, #tpu.memory_space<vmem>>, %arg5: memref<1x8x8xf32, #tpu.memory_space<vmem>>) attributes {dimension_semantics = [#tpu.dimension_semantics<parallel>], iteration_bounds = array<i64: 2>, scalar_prefetch = 0 : i64, scratch_operands = 0 : i64, tpu.core_type = #tpu.core_type<tc>, window_params = [{transform_indices = @transform_0, window_bounds = array<i64: 1, 8, 8>}, {transform_indices = @transform_1, window_bounds = array<i64: 1, 8, 64>}, {pipeline_mode = #tpu.pipeline_mode<synchronous>, transform_indices = @transform_2, window_bounds = array<i64: 15, 64, 64>}, {pipeline_mode = #tpu.pipeline_mode<synchronous>, transform_indices = @transform_3, window_bounds = array<i64: 15, 1, 64>}, {transform_indices = @transform_4, window_bounds = array<i64: 1, 8, 8>}]} {
    %c0 = arith.constant 0 : index
    %c0_0 = arith.constant 0 : index
    %c0_1 = arith.constant 0 : index
    %0 = vector.load %arg1[%c0, %c0_0, %c0_1] : memref<1x8x8xf32, #tpu.memory_space<vmem>>, vector<1x8x8xf32>
    %1 = vector.shape_cast %0 : vector<1x8x8xf32> to vector<8x8xf32>
    %c0_2 = arith.constant 0 : index
    %c0_3 = arith.constant 0 : index
    %c0_4 = arith.constant 0 : index
    %2 = vector.load %arg2[%c0_2, %c0_3, %c0_4] : memref<1x8x64xf32, #tpu.memory_space<vmem>>, vector<1x8x64xf32>
    %3 = vector.shape_cast %2 : vector<1x8x64xf32> to vector<8x64xf32>
    %4 = tpu.iota {dimensions = array<i32: 1>} : vector<8x64xi32>
    %c8_i32 = arith.constant 8 : i32
    %5 = vector.broadcast %c8_i32 : i32 to vector<8x64xi32>
    %6 = arith.cmpi slt, %4, %5 : vector<8x64xi32>
    %c0_5 = arith.constant 0 : index
    %c0_6 = arith.constant 0 : index
    %c0_7 = arith.constant 0 : index
    %7 = vector.load %arg3[%c0_5, %c0_6, %c0_7] : memref<15x64x64xf32, #tpu.memory_space<vmem>>, vector<1x64x64xf32>
    %8 = vector.shape_cast %7 : vector<1x64x64xf32> to vector<64x64xf32>
    %c0_8 = arith.constant 0 : index
    %c0_9 = arith.constant 0 : index
    %c0_10 = arith.constant 0 : index
    %9 = vector.load %arg4[%c0_8, %c0_9, %c0_10] : memref<15x1x64xf32, #tpu.memory_space<vmem>>, vector<1x1x64xf32>
    %10 = vector.shape_cast %9 : vector<1x1x64xf32> to vector<1x64xf32>
    %cst = arith.constant dense<0.000000e+00> : vector<8x64xf32>
    %11 = tpu.matmul %3, %8, %cst {dimension_numbers = #tpu.dot_dimension_numbers<[1], [0], [0], [1], [0, 0, 1, 1], [], []>} : vector<8x64xf32>, vector<64x64xf32>, vector<8x64xf32> -> vector<8x64xf32>
    %cst_11 = arith.constant dense<0.000000e+00> : vector<8x64xf32>
    %12 = tpu.matmul %1, %11, %cst_11 {dimension_numbers = #tpu.dot_dimension_numbers<[1], [0], [0], [1], [0, 0, 1, 1], [], []>} : vector<8x8xf32>, vector<8x64xf32>, vector<8x64xf32> -> vector<8x64xf32>
    %13 = vector.broadcast %10 : vector<1x64xf32> to vector<8x64xf32>
    %14 = arith.addf %12, %13 : vector<8x64xf32>
    %cst_12 = arith.constant 0.000000e+00 : f32
    %15 = vector.broadcast %cst_12 : f32 to vector<8x64xf32>
    %16 = arith.maximumf %14, %15 : vector<8x64xf32>
    %c1 = arith.constant 1 : index
    %c0_13 = arith.constant 0 : index
    %c0_14 = arith.constant 0 : index
    %17 = vector.load %arg3[%c1, %c0_13, %c0_14] : memref<15x64x64xf32, #tpu.memory_space<vmem>>, vector<1x64x64xf32>
    %18 = vector.shape_cast %17 : vector<1x64x64xf32> to vector<64x64xf32>
    %c1_15 = arith.constant 1 : index
    %c0_16 = arith.constant 0 : index
    %c0_17 = arith.constant 0 : index
    %19 = vector.load %arg4[%c1_15, %c0_16, %c0_17] : memref<15x1x64xf32, #tpu.memory_space<vmem>>, vector<1x1x64xf32>
    %20 = vector.shape_cast %19 : vector<1x1x64xf32> to vector<1x64xf32>
    %cst_18 = arith.constant dense<0.000000e+00> : vector<8x64xf32>
    %21 = tpu.matmul %16, %18, %cst_18 {dimension_numbers = #tpu.dot_dimension_numbers<[1], [0], [0], [1], [0, 0, 1, 1], [], []>} : vector<8x64xf32>, vector<64x64xf32>, vector<8x64xf32> -> vector<8x64xf32>
    %cst_19 = arith.constant dense<0.000000e+00> : vector<8x64xf32>
    %22 = tpu.matmul %1, %21, %cst_19 {dimension_numbers = #tpu.dot_dimension_numbers<[1], [0], [0], [1], [0, 0, 1, 1], [], []>} : vector<8x8xf32>, vector<8x64xf32>, vector<8x64xf32> -> vector<8x64xf32>
    %23 = vector.broadcast %20 : vector<1x64xf32> to vector<8x64xf32>
    %24 = arith.addf %22, %23 : vector<8x64xf32>
    %cst_20 = arith.constant 0.000000e+00 : f32
    %25 = vector.broadcast %cst_20 : f32 to vector<8x64xf32>
    %26 = arith.maximumf %24, %25 : vector<8x64xf32>
    %c2 = arith.constant 2 : index
    %c0_21 = arith.constant 0 : index
    %c0_22 = arith.constant 0 : index
    %27 = vector.load %arg3[%c2, %c0_21, %c0_22] : memref<15x64x64xf32, #tpu.memory_space<vmem>>, vector<1x64x64xf32>
    %28 = vector.shape_cast %27 : vector<1x64x64xf32> to vector<64x64xf32>
    %c2_23 = arith.constant 2 : index
    %c0_24 = arith.constant 0 : index
    %c0_25 = arith.constant 0 : index
    %29 = vector.load %arg4[%c2_23, %c0_24, %c0_25] : memref<15x1x64xf32, #tpu.memory_space<vmem>>, vector<1x1x64xf32>
    %30 = vector.shape_cast %29 : vector<1x1x64xf32> to vector<1x64xf32>
    %cst_26 = arith.constant dense<0.000000e+00> : vector<8x64xf32>
    %31 = tpu.matmul %26, %28, %cst_26 {dimension_numbers = #tpu.dot_dimension_numbers<[1], [0], [0], [1], [0, 0, 1, 1], [], []>} : vector<8x64xf32>, vector<64x64xf32>, vector<8x64xf32> -> vector<8x64xf32>
    %cst_27 = arith.constant dense<0.000000e+00> : vector<8x64xf32>
    %32 = tpu.matmul %1, %31, %cst_27 {dimension_numbers = #tpu.dot_dimension_numbers<[1], [0], [0], [1], [0, 0, 1, 1], [], []>} : vector<8x8xf32>, vector<8x64xf32>, vector<8x64xf32> -> vector<8x64xf32>
    %33 = vector.broadcast %30 : vector<1x64xf32> to vector<8x64xf32>
    %34 = arith.addf %32, %33 : vector<8x64xf32>
    %35 = vector.extract_strided_slice %34 {offsets = [0, 0], sizes = [8, 8], strides = [1, 1]} : vector<8x64xf32> to vector<8x8xf32>
    %cst_28 = arith.constant dense<0xFF800000> : vector<8xf32>
    %36 = vector.multi_reduction <maximumf>, %35, %cst_28 [1] : vector<8x8xf32> to vector<8xf32>
    %37 = vector.shape_cast %36 : vector<8xf32> to vector<8x1xf32>
    %38 = vector.broadcast %37 : vector<8x1xf32> to vector<8x64xf32>
    %39 = arith.subf %34, %38 : vector<8x64xf32>
    %40 = math.exp %39 : vector<8x64xf32>
    %41 = vector.extract_strided_slice %40 {offsets = [0, 0], sizes = [8, 8], strides = [1, 1]} : vector<8x64xf32> to vector<8x8xf32>
    %cst_29 = arith.constant dense<0.000000e+00> : vector<8xf32>
    %42 = vector.multi_reduction <add>, %41, %cst_29 [1] : vector<8x8xf32> to vector<8xf32>
    %43 = vector.shape_cast %42 : vector<8xf32> to vector<8x1xf32>
    %44 = tpu.reciprocal %43 {approx = true} : vector<8x1xf32> -> vector<8x1xf32>
    %45 = vector.broadcast %44 : vector<8x1xf32> to vector<8x64xf32>
    %46 = arith.mulf %40, %45 : vector<8x64xf32>
    %47 = arith.select %6, %46, %34 : vector<8x64xi1>, vector<8x64xf32>
    %c3 = arith.constant 3 : index
    %c0_30 = arith.constant 0 : index
    %c0_31 = arith.constant 0 : index
    %48 = vector.load %arg3[%c3, %c0_30, %c0_31] : memref<15x64x64xf32, #tpu.memory_space<vmem>>, vector<1x64x64xf32>
    %49 = vector.shape_cast %48 : vector<1x64x64xf32> to vector<64x64xf32>
    %c3_32 = arith.constant 3 : index
    %c0_33 = arith.constant 0 : index
    %c0_34 = arith.constant 0 : index
    %50 = vector.load %arg4[%c3_32, %c0_33, %c0_34] : memref<15x1x64xf32, #tpu.memory_space<vmem>>, vector<1x1x64xf32>
    %51 = vector.shape_cast %50 : vector<1x1x64xf32> to vector<1x64xf32>
    %cst_35 = arith.constant dense<0.000000e+00> : vector<8x64xf32>
    %52 = tpu.matmul %47, %49, %cst_35 {dimension_numbers = #tpu.dot_dimension_numbers<[1], [0], [0], [1], [0, 0, 1, 1], [], []>} : vector<8x64xf32>, vector<64x64xf32>, vector<8x64xf32> -> vector<8x64xf32>
    %cst_36 = arith.constant dense<0.000000e+00> : vector<8x64xf32>
    %53 = tpu.matmul %1, %52, %cst_36 {dimension_numbers = #tpu.dot_dimension_numbers<[1], [0], [0], [1], [0, 0, 1, 1], [], []>} : vector<8x8xf32>, vector<8x64xf32>, vector<8x64xf32> -> vector<8x64xf32>
    %54 = vector.broadcast %51 : vector<1x64xf32> to vector<8x64xf32>
    %55 = arith.addf %53, %54 : vector<8x64xf32>
    %cst_37 = arith.constant 0.000000e+00 : f32
    %56 = vector.broadcast %cst_37 : f32 to vector<8x64xf32>
    %57 = arith.maximumf %55, %56 : vector<8x64xf32>
    %c4 = arith.constant 4 : index
    %c0_38 = arith.constant 0 : index
    %c0_39 = arith.constant 0 : index
    %58 = vector.load %arg3[%c4, %c0_38, %c0_39] : memref<15x64x64xf32, #tpu.memory_space<vmem>>, vector<1x64x64xf32>
    %59 = vector.shape_cast %58 : vector<1x64x64xf32> to vector<64x64xf32>
    %c4_40 = arith.constant 4 : index
    %c0_41 = arith.constant 0 : index
    %c0_42 = arith.constant 0 : index
    %60 = vector.load %arg4[%c4_40, %c0_41, %c0_42] : memref<15x1x64xf32, #tpu.memory_space<vmem>>, vector<1x1x64xf32>
    %61 = vector.shape_cast %60 : vector<1x1x64xf32> to vector<1x64xf32>
    %cst_43 = arith.constant dense<0.000000e+00> : vector<8x64xf32>
    %62 = tpu.matmul %57, %59, %cst_43 {dimension_numbers = #tpu.dot_dimension_numbers<[1], [0], [0], [1], [0, 0, 1, 1], [], []>} : vector<8x64xf32>, vector<64x64xf32>, vector<8x64xf32> -> vector<8x64xf32>
    %cst_44 = arith.constant dense<0.000000e+00> : vector<8x64xf32>
    %63 = tpu.matmul %1, %62, %cst_44 {dimension_numbers = #tpu.dot_dimension_numbers<[1], [0], [0], [1], [0, 0, 1, 1], [], []>} : vector<8x8xf32>, vector<8x64xf32>, vector<8x64xf32> -> vector<8x64xf32>
    %64 = vector.broadcast %61 : vector<1x64xf32> to vector<8x64xf32>
    %65 = arith.addf %63, %64 : vector<8x64xf32>
    %cst_45 = arith.constant 0.000000e+00 : f32
    %66 = vector.broadcast %cst_45 : f32 to vector<8x64xf32>
    %67 = arith.maximumf %65, %66 : vector<8x64xf32>
    %c5 = arith.constant 5 : index
    %c0_46 = arith.constant 0 : index
    %c0_47 = arith.constant 0 : index
    %68 = vector.load %arg3[%c5, %c0_46, %c0_47] : memref<15x64x64xf32, #tpu.memory_space<vmem>>, vector<1x64x64xf32>
    %69 = vector.shape_cast %68 : vector<1x64x64xf32> to vector<64x64xf32>
    %c5_48 = arith.constant 5 : index
    %c0_49 = arith.constant 0 : index
    %c0_50 = arith.constant 0 : index
    %70 = vector.load %arg4[%c5_48, %c0_49, %c0_50] : memref<15x1x64xf32, #tpu.memory_space<vmem>>, vector<1x1x64xf32>
    %71 = vector.shape_cast %70 : vector<1x1x64xf32> to vector<1x64xf32>
    %cst_51 = arith.constant dense<0.000000e+00> : vector<8x64xf32>
    %72 = tpu.matmul %67, %69, %cst_51 {dimension_numbers = #tpu.dot_dimension_numbers<[1], [0], [0], [1], [0, 0, 1, 1], [], []>} : vector<8x64xf32>, vector<64x64xf32>, vector<8x64xf32> -> vector<8x64xf32>
    %cst_52 = arith.constant dense<0.000000e+00> : vector<8x64xf32>
    %73 = tpu.matmul %1, %72, %cst_52 {dimension_numbers = #tpu.dot_dimension_numbers<[1], [0], [0], [1], [0, 0, 1, 1], [], []>} : vector<8x8xf32>, vector<8x64xf32>, vector<8x64xf32> -> vector<8x64xf32>
    %74 = vector.broadcast %71 : vector<1x64xf32> to vector<8x64xf32>
    %75 = arith.addf %73, %74 : vector<8x64xf32>
    %76 = vector.extract_strided_slice %75 {offsets = [0, 0], sizes = [8, 8], strides = [1, 1]} : vector<8x64xf32> to vector<8x8xf32>
    %cst_53 = arith.constant dense<0xFF800000> : vector<8xf32>
    %77 = vector.multi_reduction <maximumf>, %76, %cst_53 [1] : vector<8x8xf32> to vector<8xf32>
    %78 = vector.shape_cast %77 : vector<8xf32> to vector<8x1xf32>
    %79 = vector.broadcast %78 : vector<8x1xf32> to vector<8x64xf32>
    %80 = arith.subf %75, %79 : vector<8x64xf32>
    %81 = math.exp %80 : vector<8x64xf32>
    %82 = vector.extract_strided_slice %81 {offsets = [0, 0], sizes = [8, 8], strides = [1, 1]} : vector<8x64xf32> to vector<8x8xf32>
    %cst_54 = arith.constant dense<0.000000e+00> : vector<8xf32>
    %83 = vector.multi_reduction <add>, %82, %cst_54 [1] : vector<8x8xf32> to vector<8xf32>
    %84 = vector.shape_cast %83 : vector<8xf32> to vector<8x1xf32>
    %85 = tpu.reciprocal %84 {approx = true} : vector<8x1xf32> -> vector<8x1xf32>
    %86 = vector.broadcast %85 : vector<8x1xf32> to vector<8x64xf32>
    %87 = arith.mulf %81, %86 : vector<8x64xf32>
    %88 = arith.select %6, %87, %75 : vector<8x64xi1>, vector<8x64xf32>
    %c6 = arith.constant 6 : index
    %c0_55 = arith.constant 0 : index
    %c0_56 = arith.constant 0 : index
    %89 = vector.load %arg3[%c6, %c0_55, %c0_56] : memref<15x64x64xf32, #tpu.memory_space<vmem>>, vector<1x64x64xf32>
    %90 = vector.shape_cast %89 : vector<1x64x64xf32> to vector<64x64xf32>
    %c6_57 = arith.constant 6 : index
    %c0_58 = arith.constant 0 : index
    %c0_59 = arith.constant 0 : index
    %91 = vector.load %arg4[%c6_57, %c0_58, %c0_59] : memref<15x1x64xf32, #tpu.memory_space<vmem>>, vector<1x1x64xf32>
    %92 = vector.shape_cast %91 : vector<1x1x64xf32> to vector<1x64xf32>
    %cst_60 = arith.constant dense<0.000000e+00> : vector<8x64xf32>
    %93 = tpu.matmul %88, %90, %cst_60 {dimension_numbers = #tpu.dot_dimension_numbers<[1], [0], [0], [1], [0, 0, 1, 1], [], []>} : vector<8x64xf32>, vector<64x64xf32>, vector<8x64xf32> -> vector<8x64xf32>
    %cst_61 = arith.constant dense<0.000000e+00> : vector<8x64xf32>
    %94 = tpu.matmul %1, %93, %cst_61 {dimension_numbers = #tpu.dot_dimension_numbers<[1], [0], [0], [1], [0, 0, 1, 1], [], []>} : vector<8x8xf32>, vector<8x64xf32>, vector<8x64xf32> -> vector<8x64xf32>
    %95 = vector.broadcast %92 : vector<1x64xf32> to vector<8x64xf32>
    %96 = arith.addf %94, %95 : vector<8x64xf32>
    %cst_62 = arith.constant 0.000000e+00 : f32
    %97 = vector.broadcast %cst_62 : f32 to vector<8x64xf32>
    %98 = arith.maximumf %96, %97 : vector<8x64xf32>
    %c7 = arith.constant 7 : index
    %c0_63 = arith.constant 0 : index
    %c0_64 = arith.constant 0 : index
    %99 = vector.load %arg3[%c7, %c0_63, %c0_64] : memref<15x64x64xf32, #tpu.memory_space<vmem>>, vector<1x64x64xf32>
    %100 = vector.shape_cast %99 : vector<1x64x64xf32> to vector<64x64xf32>
    %c7_65 = arith.constant 7 : index
    %c0_66 = arith.constant 0 : index
    %c0_67 = arith.constant 0 : index
    %101 = vector.load %arg4[%c7_65, %c0_66, %c0_67] : memref<15x1x64xf32, #tpu.memory_space<vmem>>, vector<1x1x64xf32>
    %102 = vector.shape_cast %101 : vector<1x1x64xf32> to vector<1x64xf32>
    %cst_68 = arith.constant dense<0.000000e+00> : vector<8x64xf32>
    %103 = tpu.matmul %98, %100, %cst_68 {dimension_numbers = #tpu.dot_dimension_numbers<[1], [0], [0], [1], [0, 0, 1, 1], [], []>} : vector<8x64xf32>, vector<64x64xf32>, vector<8x64xf32> -> vector<8x64xf32>
    %cst_69 = arith.constant dense<0.000000e+00> : vector<8x64xf32>
    %104 = tpu.matmul %1, %103, %cst_69 {dimension_numbers = #tpu.dot_dimension_numbers<[1], [0], [0], [1], [0, 0, 1, 1], [], []>} : vector<8x8xf32>, vector<8x64xf32>, vector<8x64xf32> -> vector<8x64xf32>
    %105 = vector.broadcast %102 : vector<1x64xf32> to vector<8x64xf32>
    %106 = arith.addf %104, %105 : vector<8x64xf32>
    %cst_70 = arith.constant 0.000000e+00 : f32
    %107 = vector.broadcast %cst_70 : f32 to vector<8x64xf32>
    %108 = arith.maximumf %106, %107 : vector<8x64xf32>
    %c8 = arith.constant 8 : index
    %c0_71 = arith.constant 0 : index
    %c0_72 = arith.constant 0 : index
    %109 = vector.load %arg3[%c8, %c0_71, %c0_72] : memref<15x64x64xf32, #tpu.memory_space<vmem>>, vector<1x64x64xf32>
    %110 = vector.shape_cast %109 : vector<1x64x64xf32> to vector<64x64xf32>
    %c8_73 = arith.constant 8 : index
    %c0_74 = arith.constant 0 : index
    %c0_75 = arith.constant 0 : index
    %111 = vector.load %arg4[%c8_73, %c0_74, %c0_75] : memref<15x1x64xf32, #tpu.memory_space<vmem>>, vector<1x1x64xf32>
    %112 = vector.shape_cast %111 : vector<1x1x64xf32> to vector<1x64xf32>
    %cst_76 = arith.constant dense<0.000000e+00> : vector<8x64xf32>
    %113 = tpu.matmul %108, %110, %cst_76 {dimension_numbers = #tpu.dot_dimension_numbers<[1], [0], [0], [1], [0, 0, 1, 1], [], []>} : vector<8x64xf32>, vector<64x64xf32>, vector<8x64xf32> -> vector<8x64xf32>
    %cst_77 = arith.constant dense<0.000000e+00> : vector<8x64xf32>
    %114 = tpu.matmul %1, %113, %cst_77 {dimension_numbers = #tpu.dot_dimension_numbers<[1], [0], [0], [1], [0, 0, 1, 1], [], []>} : vector<8x8xf32>, vector<8x64xf32>, vector<8x64xf32> -> vector<8x64xf32>
    %115 = vector.broadcast %112 : vector<1x64xf32> to vector<8x64xf32>
    %116 = arith.addf %114, %115 : vector<8x64xf32>
    %117 = vector.extract_strided_slice %116 {offsets = [0, 0], sizes = [8, 8], strides = [1, 1]} : vector<8x64xf32> to vector<8x8xf32>
    %cst_78 = arith.constant dense<0xFF800000> : vector<8xf32>
    %118 = vector.multi_reduction <maximumf>, %117, %cst_78 [1] : vector<8x8xf32> to vector<8xf32>
    %119 = vector.shape_cast %118 : vector<8xf32> to vector<8x1xf32>
    %120 = vector.broadcast %119 : vector<8x1xf32> to vector<8x64xf32>
    %121 = arith.subf %116, %120 : vector<8x64xf32>
    %122 = math.exp %121 : vector<8x64xf32>
    %123 = vector.extract_strided_slice %122 {offsets = [0, 0], sizes = [8, 8], strides = [1, 1]} : vector<8x64xf32> to vector<8x8xf32>
    %cst_79 = arith.constant dense<0.000000e+00> : vector<8xf32>
    %124 = vector.multi_reduction <add>, %123, %cst_79 [1] : vector<8x8xf32> to vector<8xf32>
    %125 = vector.shape_cast %124 : vector<8xf32> to vector<8x1xf32>
    %126 = tpu.reciprocal %125 {approx = true} : vector<8x1xf32> -> vector<8x1xf32>
    %127 = vector.broadcast %126 : vector<8x1xf32> to vector<8x64xf32>
    %128 = arith.mulf %122, %127 : vector<8x64xf32>
    %129 = arith.select %6, %128, %116 : vector<8x64xi1>, vector<8x64xf32>
    %c9 = arith.constant 9 : index
    %c0_80 = arith.constant 0 : index
    %c0_81 = arith.constant 0 : index
    %130 = vector.load %arg3[%c9, %c0_80, %c0_81] : memref<15x64x64xf32, #tpu.memory_space<vmem>>, vector<1x64x64xf32>
    %131 = vector.shape_cast %130 : vector<1x64x64xf32> to vector<64x64xf32>
    %c9_82 = arith.constant 9 : index
    %c0_83 = arith.constant 0 : index
    %c0_84 = arith.constant 0 : index
    %132 = vector.load %arg4[%c9_82, %c0_83, %c0_84] : memref<15x1x64xf32, #tpu.memory_space<vmem>>, vector<1x1x64xf32>
    %133 = vector.shape_cast %132 : vector<1x1x64xf32> to vector<1x64xf32>
    %cst_85 = arith.constant dense<0.000000e+00> : vector<8x64xf32>
    %134 = tpu.matmul %129, %131, %cst_85 {dimension_numbers = #tpu.dot_dimension_numbers<[1], [0], [0], [1], [0, 0, 1, 1], [], []>} : vector<8x64xf32>, vector<64x64xf32>, vector<8x64xf32> -> vector<8x64xf32>
    %cst_86 = arith.constant dense<0.000000e+00> : vector<8x64xf32>
    %135 = tpu.matmul %1, %134, %cst_86 {dimension_numbers = #tpu.dot_dimension_numbers<[1], [0], [0], [1], [0, 0, 1, 1], [], []>} : vector<8x8xf32>, vector<8x64xf32>, vector<8x64xf32> -> vector<8x64xf32>
    %136 = vector.broadcast %133 : vector<1x64xf32> to vector<8x64xf32>
    %137 = arith.addf %135, %136 : vector<8x64xf32>
    %cst_87 = arith.constant 0.000000e+00 : f32
    %138 = vector.broadcast %cst_87 : f32 to vector<8x64xf32>
    %139 = arith.maximumf %137, %138 : vector<8x64xf32>
    %c10 = arith.constant 10 : index
    %c0_88 = arith.constant 0 : index
    %c0_89 = arith.constant 0 : index
    %140 = vector.load %arg3[%c10, %c0_88, %c0_89] : memref<15x64x64xf32, #tpu.memory_space<vmem>>, vector<1x64x64xf32>
    %141 = vector.shape_cast %140 : vector<1x64x64xf32> to vector<64x64xf32>
    %c10_90 = arith.constant 10 : index
    %c0_91 = arith.constant 0 : index
    %c0_92 = arith.constant 0 : index
    %142 = vector.load %arg4[%c10_90, %c0_91, %c0_92] : memref<15x1x64xf32, #tpu.memory_space<vmem>>, vector<1x1x64xf32>
    %143 = vector.shape_cast %142 : vector<1x1x64xf32> to vector<1x64xf32>
    %cst_93 = arith.constant dense<0.000000e+00> : vector<8x64xf32>
    %144 = tpu.matmul %139, %141, %cst_93 {dimension_numbers = #tpu.dot_dimension_numbers<[1], [0], [0], [1], [0, 0, 1, 1], [], []>} : vector<8x64xf32>, vector<64x64xf32>, vector<8x64xf32> -> vector<8x64xf32>
    %cst_94 = arith.constant dense<0.000000e+00> : vector<8x64xf32>
    %145 = tpu.matmul %1, %144, %cst_94 {dimension_numbers = #tpu.dot_dimension_numbers<[1], [0], [0], [1], [0, 0, 1, 1], [], []>} : vector<8x8xf32>, vector<8x64xf32>, vector<8x64xf32> -> vector<8x64xf32>
    %146 = vector.broadcast %143 : vector<1x64xf32> to vector<8x64xf32>
    %147 = arith.addf %145, %146 : vector<8x64xf32>
    %cst_95 = arith.constant 0.000000e+00 : f32
    %148 = vector.broadcast %cst_95 : f32 to vector<8x64xf32>
    %149 = arith.maximumf %147, %148 : vector<8x64xf32>
    %c11 = arith.constant 11 : index
    %c0_96 = arith.constant 0 : index
    %c0_97 = arith.constant 0 : index
    %150 = vector.load %arg3[%c11, %c0_96, %c0_97] : memref<15x64x64xf32, #tpu.memory_space<vmem>>, vector<1x64x64xf32>
    %151 = vector.shape_cast %150 : vector<1x64x64xf32> to vector<64x64xf32>
    %c11_98 = arith.constant 11 : index
    %c0_99 = arith.constant 0 : index
    %c0_100 = arith.constant 0 : index
    %152 = vector.load %arg4[%c11_98, %c0_99, %c0_100] : memref<15x1x64xf32, #tpu.memory_space<vmem>>, vector<1x1x64xf32>
    %153 = vector.shape_cast %152 : vector<1x1x64xf32> to vector<1x64xf32>
    %cst_101 = arith.constant dense<0.000000e+00> : vector<8x64xf32>
    %154 = tpu.matmul %149, %151, %cst_101 {dimension_numbers = #tpu.dot_dimension_numbers<[1], [0], [0], [1], [0, 0, 1, 1], [], []>} : vector<8x64xf32>, vector<64x64xf32>, vector<8x64xf32> -> vector<8x64xf32>
    %cst_102 = arith.constant dense<0.000000e+00> : vector<8x64xf32>
    %155 = tpu.matmul %1, %154, %cst_102 {dimension_numbers = #tpu.dot_dimension_numbers<[1], [0], [0], [1], [0, 0, 1, 1], [], []>} : vector<8x8xf32>, vector<8x64xf32>, vector<8x64xf32> -> vector<8x64xf32>
    %156 = vector.broadcast %153 : vector<1x64xf32> to vector<8x64xf32>
    %157 = arith.addf %155, %156 : vector<8x64xf32>
    %158 = vector.extract_strided_slice %157 {offsets = [0, 0], sizes = [8, 8], strides = [1, 1]} : vector<8x64xf32> to vector<8x8xf32>
    %cst_103 = arith.constant dense<0xFF800000> : vector<8xf32>
    %159 = vector.multi_reduction <maximumf>, %158, %cst_103 [1] : vector<8x8xf32> to vector<8xf32>
    %160 = vector.shape_cast %159 : vector<8xf32> to vector<8x1xf32>
    %161 = vector.broadcast %160 : vector<8x1xf32> to vector<8x64xf32>
    %162 = arith.subf %157, %161 : vector<8x64xf32>
    %163 = math.exp %162 : vector<8x64xf32>
    %164 = vector.extract_strided_slice %163 {offsets = [0, 0], sizes = [8, 8], strides = [1, 1]} : vector<8x64xf32> to vector<8x8xf32>
    %cst_104 = arith.constant dense<0.000000e+00> : vector<8xf32>
    %165 = vector.multi_reduction <add>, %164, %cst_104 [1] : vector<8x8xf32> to vector<8xf32>
    %166 = vector.shape_cast %165 : vector<8xf32> to vector<8x1xf32>
    %167 = tpu.reciprocal %166 {approx = true} : vector<8x1xf32> -> vector<8x1xf32>
    %168 = vector.broadcast %167 : vector<8x1xf32> to vector<8x64xf32>
    %169 = arith.mulf %163, %168 : vector<8x64xf32>
    %170 = arith.select %6, %169, %157 : vector<8x64xi1>, vector<8x64xf32>
    %c12 = arith.constant 12 : index
    %c0_105 = arith.constant 0 : index
    %c0_106 = arith.constant 0 : index
    %171 = vector.load %arg3[%c12, %c0_105, %c0_106] : memref<15x64x64xf32, #tpu.memory_space<vmem>>, vector<1x64x64xf32>
    %172 = vector.shape_cast %171 : vector<1x64x64xf32> to vector<64x64xf32>
    %c12_107 = arith.constant 12 : index
    %c0_108 = arith.constant 0 : index
    %c0_109 = arith.constant 0 : index
    %173 = vector.load %arg4[%c12_107, %c0_108, %c0_109] : memref<15x1x64xf32, #tpu.memory_space<vmem>>, vector<1x1x64xf32>
    %174 = vector.shape_cast %173 : vector<1x1x64xf32> to vector<1x64xf32>
    %cst_110 = arith.constant dense<0.000000e+00> : vector<8x64xf32>
    %175 = tpu.matmul %170, %172, %cst_110 {dimension_numbers = #tpu.dot_dimension_numbers<[1], [0], [0], [1], [0, 0, 1, 1], [], []>} : vector<8x64xf32>, vector<64x64xf32>, vector<8x64xf32> -> vector<8x64xf32>
    %cst_111 = arith.constant dense<0.000000e+00> : vector<8x64xf32>
    %176 = tpu.matmul %1, %175, %cst_111 {dimension_numbers = #tpu.dot_dimension_numbers<[1], [0], [0], [1], [0, 0, 1, 1], [], []>} : vector<8x8xf32>, vector<8x64xf32>, vector<8x64xf32> -> vector<8x64xf32>
    %177 = vector.broadcast %174 : vector<1x64xf32> to vector<8x64xf32>
    %178 = arith.addf %176, %177 : vector<8x64xf32>
    %cst_112 = arith.constant 0.000000e+00 : f32
    %179 = vector.broadcast %cst_112 : f32 to vector<8x64xf32>
    %180 = arith.maximumf %178, %179 : vector<8x64xf32>
    %c13 = arith.constant 13 : index
    %c0_113 = arith.constant 0 : index
    %c0_114 = arith.constant 0 : index
    %181 = vector.load %arg3[%c13, %c0_113, %c0_114] : memref<15x64x64xf32, #tpu.memory_space<vmem>>, vector<1x64x64xf32>
    %182 = vector.shape_cast %181 : vector<1x64x64xf32> to vector<64x64xf32>
    %c13_115 = arith.constant 13 : index
    %c0_116 = arith.constant 0 : index
    %c0_117 = arith.constant 0 : index
    %183 = vector.load %arg4[%c13_115, %c0_116, %c0_117] : memref<15x1x64xf32, #tpu.memory_space<vmem>>, vector<1x1x64xf32>
    %184 = vector.shape_cast %183 : vector<1x1x64xf32> to vector<1x64xf32>
    %cst_118 = arith.constant dense<0.000000e+00> : vector<8x64xf32>
    %185 = tpu.matmul %180, %182, %cst_118 {dimension_numbers = #tpu.dot_dimension_numbers<[1], [0], [0], [1], [0, 0, 1, 1], [], []>} : vector<8x64xf32>, vector<64x64xf32>, vector<8x64xf32> -> vector<8x64xf32>
    %cst_119 = arith.constant dense<0.000000e+00> : vector<8x64xf32>
    %186 = tpu.matmul %1, %185, %cst_119 {dimension_numbers = #tpu.dot_dimension_numbers<[1], [0], [0], [1], [0, 0, 1, 1], [], []>} : vector<8x8xf32>, vector<8x64xf32>, vector<8x64xf32> -> vector<8x64xf32>
    %187 = vector.broadcast %184 : vector<1x64xf32> to vector<8x64xf32>
    %188 = arith.addf %186, %187 : vector<8x64xf32>
    %cst_120 = arith.constant 0.000000e+00 : f32
    %189 = vector.broadcast %cst_120 : f32 to vector<8x64xf32>
    %190 = arith.maximumf %188, %189 : vector<8x64xf32>
    %c14 = arith.constant 14 : index
    %c0_121 = arith.constant 0 : index
    %c0_122 = arith.constant 0 : index
    %191 = vector.load %arg3[%c14, %c0_121, %c0_122] : memref<15x64x64xf32, #tpu.memory_space<vmem>>, vector<1x64x64xf32>
    %192 = vector.shape_cast %191 : vector<1x64x64xf32> to vector<64x64xf32>
    %c14_123 = arith.constant 14 : index
    %c0_124 = arith.constant 0 : index
    %c0_125 = arith.constant 0 : index
    %193 = vector.load %arg4[%c14_123, %c0_124, %c0_125] : memref<15x1x64xf32, #tpu.memory_space<vmem>>, vector<1x1x64xf32>
    %194 = vector.shape_cast %193 : vector<1x1x64xf32> to vector<1x64xf32>
    %cst_126 = arith.constant dense<0.000000e+00> : vector<8x64xf32>
    %195 = tpu.matmul %190, %192, %cst_126 {dimension_numbers = #tpu.dot_dimension_numbers<[1], [0], [0], [1], [0, 0, 1, 1], [], []>} : vector<8x64xf32>, vector<64x64xf32>, vector<8x64xf32> -> vector<8x64xf32>
    %cst_127 = arith.constant dense<0.000000e+00> : vector<8x64xf32>
    %196 = tpu.matmul %1, %195, %cst_127 {dimension_numbers = #tpu.dot_dimension_numbers<[1], [0], [0], [1], [0, 0, 1, 1], [], []>} : vector<8x8xf32>, vector<8x64xf32>, vector<8x64xf32> -> vector<8x64xf32>
    %197 = vector.broadcast %194 : vector<1x64xf32> to vector<8x64xf32>
    %198 = arith.addf %196, %197 : vector<8x64xf32>
    %199 = vector.extract_strided_slice %198 {offsets = [0, 0], sizes = [8, 8], strides = [1, 1]} : vector<8x64xf32> to vector<8x8xf32>
    %cst_128 = arith.constant dense<0xFF800000> : vector<8xf32>
    %200 = vector.multi_reduction <maximumf>, %199, %cst_128 [1] : vector<8x8xf32> to vector<8xf32>
    %201 = vector.shape_cast %200 : vector<8xf32> to vector<8x1xf32>
    %202 = vector.broadcast %201 : vector<8x1xf32> to vector<8x8xf32>
    %203 = arith.subf %199, %202 : vector<8x8xf32>
    %204 = math.exp %203 : vector<8x8xf32>
    %cst_129 = arith.constant dense<0.000000e+00> : vector<8xf32>
    %205 = vector.multi_reduction <add>, %204, %cst_129 [1] : vector<8x8xf32> to vector<8xf32>
    %206 = vector.shape_cast %205 : vector<8xf32> to vector<8x1xf32>
    %207 = vector.broadcast %206 : vector<8x1xf32> to vector<8x8xf32>
    %208 = arith.divf %204, %207 : vector<8x8xf32>
    %c0_130 = arith.constant 0 : index
    %c0_131 = arith.constant 0 : index
    %c0_132 = arith.constant 0 : index
    %209 = vector.load %arg5[%c0_130, %c0_131, %c0_132] : memref<1x8x8xf32, #tpu.memory_space<vmem>>, vector<1x8x8xf32>
    %210 = vector.shape_cast %209 : vector<1x8x8xf32> to vector<8x8xf32>
    %211 = vector.shape_cast %208 : vector<8x8xf32> to vector<1x8x8xf32>
    tpu.vector_store %arg5[%c0_130, %c0_131, %c0_132], %211 {strides = array<i32>} : memref<1x8x8xf32, #tpu.memory_space<vmem>>, vector<1x8x8xf32>,
    return
  }
  func.func @transform_0(%arg0: i32) -> (i32, i32, i32) {
    %c0_i32 = arith.constant 0 : i32
    %c0_i32_0 = arith.constant 0 : i32
    %c0_i32_1 = arith.constant 0 : i32
    return %arg0, %c0_i32, %c0_i32_0 : i32, i32, i32
  }
  func.func @transform_1(%arg0: i32) -> (i32, i32, i32) {
    %c0_i32 = arith.constant 0 : i32
    %c0_i32_0 = arith.constant 0 : i32
    %c0_i32_1 = arith.constant 0 : i32
    return %arg0, %c0_i32, %c0_i32_0 : i32, i32, i32
  }
  func.func @transform_2(%arg0: i32) -> (i32, i32, i32) {
    %c0_i32 = arith.constant 0 : i32
    %c0_i32_0 = arith.constant 0 : i32
    %c0_i32_1 = arith.constant 0 : i32
    %c0_i32_2 = arith.constant 0 : i32
    return %c0_i32, %c0_i32_0, %c0_i32_1 : i32, i32, i32
  }
  func.func @transform_3(%arg0: i32) -> (i32, i32, i32) {
    %c0_i32 = arith.constant 0 : i32
    %c0_i32_0 = arith.constant 0 : i32
    %c0_i32_1 = arith.constant 0 : i32
    %c0_i32_2 = arith.constant 0 : i32
    return %c0_i32, %c0_i32_0, %c0_i32_1 : i32, i32, i32
  }
  func.func @transform_4(%arg0: i32) -> (i32, i32, i32) {
    %c0_i32 = arith.constant 0 : i32
    %c0_i32_0 = arith.constant 0 : i32
    %c0_i32_1 = arith.constant 0 : i32
    return %arg0, %c0_i32, %c0_i32_0 : i32, i32, i32
  }
}

</mosaic_0001>

<bundles_post_ra>
// kernel: _model2_forward_batched.1
= control target key start
LH: loop header
LB: loop body
LE: loop exit
PB: predicated region body
PF: predicated region fallthrough
CT: control target
= control target key end

     0   :  { %9 = vsyncpa [#allocation3], 0  ;;  %s4393_s0 = inlined_call_operand.vmem [shape: f32[2,8,8], index: 0, kind: input, shape index: {}]   ;;  %s4394_s1 = inlined_call_operand.vmem [shape: f32[2,8,64], index: 1, kind: input, shape index: {}]   ;;  %s4395_s2 = inlined_call_operand.vmem [shape: f32[15,64,64], index: 2, kind: input, shape index: {}]   ;;  %s4396_s3 = inlined_call_operand.vmem [shape: f32[15,1,64], index: 3, kind: input, shape index: {}]   ;;  %s4397_s4 = inlined_call_operand.hbm [shape: f32[2,8,8], index: 4, kind: output, shape index: {}]  }
   0x1   :  { %11 = vsyncpa [#allocation3 + $0x1], 0  ;;  %s3632_s15 = smov 0   ;;  %s3634_s16 = smov 0  }
   0x2   :  { %s3636_s17 = smov 0   ;;  %s3638_s18 = smov 0  }
   0x3 LB: > { %s3653_s19 = sadd.s32 4294967295, %s3602_s18   ;;  %s2773_s20 = sadd.s32 4294967294, %s3602_s18   ;;  %s3602_s18 = sphi %s3638_s18, %s4403_s18   ;;  %s3598_s17 = sphi %s3636_s17, %s4402_s17   ;;  %s3594_s16 = sphi %s3634_s16, %s4401_s16   ;;  %s3590_s15 = sphi %s3632_s15, %s4400_s15  }
   0x4   : > { %s3657_s21 = sadd.s32 1, %s3602_s18   ;;  %s118_s22 = sadd.s32 1, %s3598_s17 }
   0x5   : > { %s115_s23 = ssub.s32 %s3602_s18, %s3657_s21  ;;  %p128_p0 = scmp.ne.s32.totalorder %s3598_s17, %s3594_s16 }
   0x6   : > { %p116_p1 = scmp.eq.s32.totalorder %s115_s23, 0  ;;  %p129_p2 = scmp.eq.s32.totalorder %s3653_s19, 1 }
   0x7   : > { %p134_p3 = scmp.ne.s32.totalorder %s3594_s16, %s3590_s15  ;;  %p135_p4 = scmp.eq.s32.totalorder %s2773_s20, 1 }
   0x8   : > { %s3668_s24 = scalar_select %p116_p1, %s3598_s17, %s118_s22  }
   0x9   : > { %p3670_p5 = por %p129_p2, %p128_p0  ;;  %p3674_p6 = por %p135_p4, %p134_p3 }
   0xa   : > { %p2776_p7 = scmp.ge.s32.totalorder %s3602_s18, 1  ;;  %p173_p8 = scmp.lt.s32.totalorder %s3602_s18, 3 }
   0xc   : > { %p174_p9 = pnand %p2776_p7, %p173_p8 }
   0xd   : > { %p202_p10 = scmp.lt.s32.totalorder (!%p174_p9), %s3653_s19, 1  ;;  %s199_s30 = sand.u32 (!%p174_p9), 1, %s3594_s16  }
   0xe   : > { %177 = sbr.rel (%p174_p9) target bundleno = 7468 (0x1d2c), region = 36  ;;  %s2777_s5 = sshll.u32 (!%p174_p9), %s199_s30, 3 }
   0xf   : > { %s2952_s6 = sshll.u32 (!%p174_p9), %s3653_s19, 7  ;;  %s3606_s14 = smov (!%p174_p9), [#allocation2]  }
  0x10   : > { %s2700_s11 = scalar_lea.hbm (!%p174_p9), %s4397_s4, %s2952_s6  ;;  %s3546_s20 = sshll.u32 (!%p174_p9), %s3606_s14, 4  ;;  %s3547_s20 = int_to_ptr.vmem [resolvable:$false] %s3546_s20 }
  0x13   : > { %v222_v0 = vld [vmem:[%s4395_s2 + $0x38] sm:$0xff]  ;;  %v3604_v1 = vmov 0.0   ;;  %v221_v2 = vld [vmem:[%s4395_s2 + $0x30] sm:$0xff]  ;;  %vm3605_vm0 = vmmov 0   ;;  %v220_v3 = vld [vmem:[%s4395_s2 + $0x28] sm:$0xff]  ;;  %s203_s7 = scalar_select %p202_p10, %s3653_s19, 1  ;;  %v212_v62 = vlaneseq }
  0x14   : > { %3120 = vmatprep.subr.mxu0 %v3604_v1  ;;  %3136 = vmatprep.mubr.msk.f32.mxu0 %vm3605_vm0, %v3604_v1  ;;  %v219_v4 = vld [vmem:[%s4395_s2 + $0x20] sm:$0xff]  ;;  %v218_v5 = vld [vmem:[%s4395_s2 + $0x18] sm:$0xff]  ;;  %v217_v6 = vld [vmem:[%s4395_s2 + $0x10] sm:$0xff]  ;;  %vm224_vm1 = vcmask 523264   ;;  %vm304_vm2 = vcmask 64512   ;;  %s3548_s19 = scalar_lea.vmem %s3547_s20, 256 }
  0x15   : > { %3121 = vmatpush3.msra.mxu0 %v222_v0  ;;  %3139 = vmatprep.subr.mxu1 %v3604_v1  ;;  %s2778_s12 = sshll.u32 %s203_s7, 3  ;;  %v216_v7 = vld [vmem:[%s4395_s2 + $0x8] sm:$0xff]  ;;  %v215_v8 = vld [vmem:[%s4395_s2] sm:$0xff]  ;;  %v2790_v12 = vld [vmem:[%s4395_s2 + $0x78] sm:$0xff]  ;;  %v3862_v63 = vand.u32 127, %v212_v62 }
  0x16   : > { %3122 = vmatprep.subr.mxu0 %v3604_v1  ;;  %3141 = vmatprep.mubr.msk.f32.mxu1 %vm3605_vm0, %v3604_v1  ;;  %s209_s28 = scalar_lea.vmem %s4394_s1, %s2778_s12  ;;  %s3729_s7 = scalar_lea.vmem %s4393_s0, %s2778_s12  ;;  %v2789_v14 = vld [vmem:[%s4395_s2 + $0x70] sm:$0xff]  ;;  %v2788_v15 = vld [vmem:[%s4395_s2 + $0x68] sm:$0xff]  ;;  %v2787_v16 = vld [vmem:[%s4395_s2 + $0x60] sm:$0xff] }
  0x17   : > { %3123 = vmatpush3.msra.mxu0 %v221_v2  ;;  %v211_v9 = vld [vmem:[%s209_s28] sm:$0xff]  ;;  %v2786_v17 = vld [vmem:[%s4395_s2 + $0x58] sm:$0xff]  ;;  %v2785_v18 = vld [vmem:[%s4395_s2 + $0x50] sm:$0xff]  ;;  %vm214_vm3 = vcmp.lt.s32.totalorder %v3862_v63, 8  ;;  %s2689_s12 = scalar_lea.sflag [#allocation3], %s199_s30 }
  0x18   : > { %3124 = vmatprep.subr.mxu0 %v3604_v1  ;;  %v3732_v10 = vld [vmem:[%s3729_s7] sm:$0xff]  ;;  %v2784_v19 = vld [vmem:[%s4395_s2 + $0x48] sm:$0xff]  ;;  %v2802_v26 = vld [vmem:[%s4395_s2 + $0xb8] sm:$0xff] }
  0x19   : > { %3125 = vmatpush3.msra.mxu0 %v220_v3  ;;  %v2783_v20 = vld [vmem:[%s4395_s2 + $0x40] sm:$0xff]  ;;  %v2801_v27 = vld [vmem:[%s4395_s2 + $0xb0] sm:$0xff]  ;;  %v2800_v28 = vld [vmem:[%s4395_s2 + $0xa8] sm:$0xff] }
  0x1a   : > { %3126 = vmatprep.subr.mxu0 %v3604_v1  ;;  %v2781_v21 = vld [vmem:[%s4396_s3] ss:$0 sm:$0xff]  ;;  %v2798_v30 = vld [vmem:[%s4395_s2 + $0x98] sm:$0xff]  ;;  %v2797_v33 = vld [vmem:[%s4395_s2 + $0x90] sm:$0xff] }
  0x1b   : > { %3127 = vmatpush3.msra.mxu0 %v219_v4  ;;  %v2799_v29 = vld [vmem:[%s4395_s2 + $0xa0] sm:$0xff]  ;;  %v2796_v34 = vld [vmem:[%s4395_s2 + $0x88] sm:$0xff]  ;;  %v2814_v53 = vld [vmem:[%s4395_s2 + $0xf8] sm:$0xff] }
  0x1c   : > { %3128 = vmatprep.subr.mxu0 %v3604_v1  ;;  %v2795_v35 = vld [vmem:[%s4395_s2 + $0x80] sm:$0xff]  ;;  %v2813_v54 = vld [vmem:[%s4395_s2 + $0xf0] sm:$0xff]  ;;  %v2812_v55 = vld [vmem:[%s4395_s2 + $0xe8] sm:$0xff] }
  0x1d   : > { %3129 = vmatpush3.msra.mxu0 %v218_v5  ;;  %v2793_v36 = vld [vmem:[%s4396_s3 + $0x1] ss:$0 sm:$0xff]  ;;  %v2805_v43 = vld [vmem:[%s4396_s3 + $0x2] ss:$0 sm:$0xff]  ;;  %v2810_v57 = vld [vmem:[%s4395_s2 + $0xd8] sm:$0xff] }
  0x1e   : > { %3130 = vmatprep.subr.mxu0 %v3604_v1  ;;  %v2811_v56 = vld [vmem:[%s4395_s2 + $0xe0] sm:$0xff]  ;;  %v2809_v58 = vld [vmem:[%s4395_s2 + $0xd0] sm:$0xff]  ;;  %v2808_v59 = vld [vmem:[%s4395_s2 + $0xc8] sm:$0xff] }
  0x1f   : > { %3131 = vmatpush3.msra.mxu0 %v217_v6  ;;  %v2807_v60 = vld [vmem:[%s4395_s2 + $0xc0] sm:$0xff]  ;;  %v2826_v4 = vld [vmem:[%s4395_s2 + $0x138] sm:$0xff]  ;;  %v2825_v5 = vld [vmem:[%s4395_s2 + $0x130] sm:$0xff] }
  0x20   : > { %3132 = vmatprep.subr.mxu0 %v3604_v1  ;;  %v2824_v6 = vld [vmem:[%s4395_s2 + $0x128] sm:$0xff]  ;;  %v2861_v62 = vld [vmem:[%s4395_s2 + $0x1f0] sm:$0xff] }
  0x21   : > { %3133 = vmatpush3.msra.mxu0 %v216_v7  ;;  %v2823_v7 = vld [vmem:[%s4395_s2 + $0x120] sm:$0xff]  ;;  %v2933_v63 = vld [vmem:[%s4395_s2 + $0x370] sm:$0xff] }
  0x22   : > { %3134 = vmatprep.subr.mxu0 %v3604_v1 }
  0x23   : > { %3135 = vmatpush3.msra.mxu0 %v215_v8  ;;  %v2822_v8 = vld [vmem:[%s4395_s2 + $0x118] sm:$0xff] }
  0x24   : > { %3137 = vmatmul.mubr.msk.f32.vlgmr.msra.gmra.mxu0 %vm224_vm1, %v211_v9  ;;  %3163 = vmatprep.subr.mxu0 %v3604_v1 }
  0x25   : > { %3165 = vmatprep.mubr.msk.f32.mxu0 %vm3605_vm0, %v3604_v1 }
  0xe4   : > { %v294_v11 = vpop.f32.mrf.mxu0 }
  0xe5   : > { %3140 = vmatpush3.msra.mxu1 %v294_v11 }
  0xe6   : > { %v3138_v13 = vpop.f32.mrf.mxu0  ;;  %3142 = vmatmul.mubr.msk.f32.vlgmr.msra.gmra.mxu1 %vm304_vm2, %v3732_v10  ;;  %3144 = vmatprep.subr.mxu1 %v3604_v1 }
  0xe7   : > { %3145 = vmatpush3.msra.mxu1 %v2790_v12  ;;  %3160 = vmatprep.mubr.msk.f32.mxu1 %vm3605_vm0, %v3604_v1  ;;  %v2821_v12 = vld [vmem:[%s4395_s2 + $0x110] sm:$0xff]  ;;  %v2820_v13 = vld [vmem:[%s4395_s2 + $0x108] sm:$0xff] }
  0xe8   : > { %3146 = vmatprep.subr.mxu1 %v3604_v1 }
  0xe9   : > { %3147 = vmatpush3.msra.mxu1 %v2789_v14  ;;  %v2819_v14 = vld [vmem:[%s4395_s2 + $0x100] sm:$0xff] }
  0xea   : > { %3148 = vmatprep.subr.mxu1 %v3604_v1 }
  0xeb   : > { %3149 = vmatpush3.msra.mxu1 %v2788_v15  ;;  %v2817_v15 = vld [vmem:[%s4396_s3 + $0x3] ss:$0 sm:$0xff] }
  0xec   : > { %3150 = vmatprep.subr.mxu1 %v3604_v1 }
  0xed   : > { %3151 = vmatpush3.msra.mxu1 %v2787_v16 }
  0xee   : > { %3152 = vmatprep.subr.mxu1 %v3604_v1 }
  0xef   : > { %3153 = vmatpush3.msra.mxu1 %v2786_v17 }
  0xf0   : > { %3154 = vmatprep.subr.mxu1 %v3604_v1 }
  0xf1   : > { %3155 = vmatpush3.msra.mxu1 %v2785_v18 }
  0xf2   : > { %3156 = vmatprep.subr.mxu1 %v3604_v1 }
  0xf3   : > { %3157 = vmatpush3.msra.mxu1 %v2784_v19 }
  0xf4   : > { %3158 = vmatprep.subr.mxu1 %v3604_v1 }
  0xf5   : > { %3159 = vmatpush3.msra.mxu1 %v2783_v20 }
  0xf6   : > { %3168 = vmatprep.subr.mxu1 %v3604_v1 }
 0x1a6   : > { %v374_v22 = vpop.f32.mrf.mxu1 }
 0x1a7   : > { %v375_v23 = vadd.f32 %v2781_v21, %v374_v22  ;;  %v2838_v21 = vld [vmem:[%s4395_s2 + $0x178] sm:$0xff] }
 0x1a8   : > { %v3143_v24 = vpop.f32.mrf.mxu1 }
 0x1a9   : > { %v378_v25 = vmax.f32 %v375_v23, 0.0  ;;  %v2837_v23 = vld [vmem:[%s4395_s2 + $0x170] sm:$0xff]  ;;  %v2836_v24 = vld [vmem:[%s4395_s2 + $0x168] sm:$0xff] }
 0x1ab   : > { %3161 = vmatmul.mubr.msk.f32.vlgmr.msra.gmra.mxu1 %vm224_vm1, %v378_v25  ;;  %v2835_v25 = vld [vmem:[%s4395_s2 + $0x160] sm:$0xff] }
 0x1ac   : > { %3184 = vmatprep.mubr.msk.f32.mxu1 %vm3605_vm0, %v3604_v1  ;;  %3169 = vmatpush3.msra.mxu1 %v2802_v26  ;;  %v2834_v26 = vld [vmem:[%s4395_s2 + $0x158] sm:$0xff] }
 0x1ad   : > { %3170 = vmatprep.subr.mxu1 %v3604_v1 }
 0x1ae   : > { %3171 = vmatpush3.msra.mxu1 %v2801_v27  ;;  %v2833_v27 = vld [vmem:[%s4395_s2 + $0x150] sm:$0xff] }
 0x1af   : > { %3172 = vmatprep.subr.mxu1 %v3604_v1 }
 0x1b0   : > { %3173 = vmatpush3.msra.mxu1 %v2800_v28  ;;  %v2832_v28 = vld [vmem:[%s4395_s2 + $0x148] sm:$0xff] }
 0x1b1   : > { %3174 = vmatprep.subr.mxu1 %v3604_v1 }
 0x1b2   : > { %3175 = vmatpush3.msra.mxu1 %v2799_v29  ;;  %v2831_v29 = vld [vmem:[%s4395_s2 + $0x140] sm:$0xff] }
 0x1b3   : > { %3176 = vmatprep.subr.mxu1 %v3604_v1 }
 0x1b4   : > { %3177 = vmatpush3.msra.mxu1 %v2798_v30  ;;  %v2829_v30 = vld [vmem:[%s4396_s3 + $0x4] ss:$0 sm:$0xff] }
 0x1b5   : > { %3178 = vmatprep.subr.mxu1 %v3604_v1 }
 0x1b6   : > { %3179 = vmatpush3.msra.mxu1 %v2797_v33 }
 0x1b7   : > { %3180 = vmatprep.subr.mxu1 %v3604_v1 }
 0x1b8   : > { %3181 = vmatpush3.msra.mxu1 %v2796_v34 }
 0x1b9   : > { %3182 = vmatprep.subr.mxu1 %v3604_v1 }
 0x1ba   : > { %3183 = vmatpush3.msra.mxu1 %v2795_v35 }
 0x1bb   : > { %3216 = vmatprep.subr.mxu1 %v3604_v1 }
 0x26b   : > { %v459_v31 = vpop.f32.mrf.mxu1 }
 0x26c   : > { %3164 = vmatpush3.msra.mxu0 %v459_v31 }
 0x26d   : > { %v3162_v32 = vpop.f32.mrf.mxu1  ;;  %3166 = vmatmul.mubr.msk.f32.vlgmr.msra.gmra.mxu0 %vm304_vm2, %v3732_v10  ;;  %3187 = vmatprep.subr.mxu0 %v3604_v1 }
 0x26e   : > { %3189 = vmatprep.mubr.msk.f32.mxu0 %vm3605_vm0, %v3604_v1 }
 0x32d   : > { %v535_v37 = vpop.f32.mrf.mxu0 }
 0x32e   : > { %v536_v38 = vadd.f32 %v2793_v36, %v535_v37  ;;  %v2841_v37 = vld [vmem:[%s4396_s3 + $0x5] ss:$0 sm:$0xff] }
 0x32f   : > { %v3167_v39 = vpop.f32.mrf.mxu0 }
 0x330   : > { %v539_v40 = vmax.f32 %v536_v38, 0.0 }
 0x332   : > { %3185 = vmatmul.mubr.msk.f32.vlgmr.msra.gmra.mxu1 %vm224_vm1, %v539_v40 }
 0x333   : > { %3232 = vmatprep.mubr.msk.f32.mxu1 %vm3605_vm0, %v3604_v1  ;;  %3217 = vmatpush3.msra.mxu1 %v2826_v4  ;;  %v2857_v4 = vld [vmem:[%s4395_s2 + $0x1d0] sm:$0xff] }
 0x334   : > { %3218 = vmatprep.subr.mxu1 %v3604_v1 }
 0x335   : > { %3219 = vmatpush3.msra.mxu1 %v2825_v5  ;;  %v2856_v5 = vld [vmem:[%s4395_s2 + $0x1c8] sm:$0xff] }
 0x336   : > { %3220 = vmatprep.subr.mxu1 %v3604_v1 }
 0x337   : > { %3221 = vmatpush3.msra.mxu1 %v2824_v6  ;;  %v2855_v6 = vld [vmem:[%s4395_s2 + $0x1c0] sm:$0xff] }
 0x338   : > { %3222 = vmatprep.subr.mxu1 %v3604_v1 }
 0x339   : > { %3223 = vmatpush3.msra.mxu1 %v2823_v7  ;;  %v2853_v7 = vld [vmem:[%s4396_s3 + $0x6] ss:$0 sm:$0xff] }
 0x33a   : > { %3224 = vmatprep.subr.mxu1 %v3604_v1 }
 0x33b   : > { %3225 = vmatpush3.msra.mxu1 %v2822_v8 }
 0x33c   : > { %3226 = vmatprep.subr.mxu1 %v3604_v1 }
 0x33d   : > { %3227 = vmatpush3.msra.mxu1 %v2821_v12 }
 0x33e   : > { %3228 = vmatprep.subr.mxu1 %v3604_v1 }
 0x33f   : > { %3229 = vmatpush3.msra.mxu1 %v2820_v13 }
 0x340   : > { %3230 = vmatprep.subr.mxu1 %v3604_v1 }
 0x341   : > { %3231 = vmatpush3.msra.mxu1 %v2819_v14  ;;  %v2874_v14 = vld [vmem:[%s4395_s2 + $0x238] sm:$0xff] }
 0x342   : > { %3259 = vmatprep.subr.mxu1 %v3604_v1 }
 0x3f2   : > { %v620_v41 = vpop.f32.mrf.mxu1 }
 0x3f3   : > { %3188 = vmatpush3.msra.mxu0 %v620_v41 }
 0x3f4   : > { %v3186_v42 = vpop.f32.mrf.mxu1  ;;  %3190 = vmatmul.mubr.msk.f32.vlgmr.msra.gmra.mxu0 %vm304_vm2, %v3732_v10  ;;  %3192 = vmatprep.subr.mxu0 %v3604_v1 }
 0x3f5   : > { %3208 = vmatprep.mubr.msk.f32.mxu0 %vm3605_vm0, %v3604_v1  ;;  %3193 = vmatpush3.msra.mxu0 %v2814_v53  ;;  %v2844_v53 = vld [vmem:[%s4395_s2 + $0x188] sm:$0xff] }
 0x3f6   : > { %3194 = vmatprep.subr.mxu0 %v3604_v1 }
 0x3f7   : > { %3195 = vmatpush3.msra.mxu0 %v2813_v54  ;;  %v2843_v54 = vld [vmem:[%s4395_s2 + $0x180] sm:$0xff] }
 0x3f8   : > { %3196 = vmatprep.subr.mxu0 %v3604_v1 }
 0x3f9   : > { %3197 = vmatpush3.msra.mxu0 %v2812_v55 }
 0x3fa   : > { %3198 = vmatprep.subr.mxu0 %v3604_v1 }
 0x3fb   : > { %3199 = vmatpush3.msra.mxu0 %v2811_v56 }
 0x3fc   : > { %3200 = vmatprep.subr.mxu0 %v3604_v1 }
 0x3fd   : > { %3201 = vmatpush3.msra.mxu0 %v2810_v57 }
 0x3fe   : > { %3202 = vmatprep.subr.mxu0 %v3604_v1 }
 0x3ff   : > { %3203 = vmatpush3.msra.mxu0 %v2809_v58 }
 0x400   : > { %3204 = vmatprep.subr.mxu0 %v3604_v1 }
 0x401   : > { %3205 = vmatpush3.msra.mxu0 %v2808_v59 }
 0x402   : > { %3206 = vmatprep.subr.mxu0 %v3604_v1 }
 0x403   : > { %3207 = vmatpush3.msra.mxu0 %v2807_v60  ;;  %v2862_v60 = vld [vmem:[%s4395_s2 + $0x1f8] sm:$0xff] }
 0x404   : > { %3211 = vmatprep.subr.mxu0 %v3604_v1 }
 0x4b4   : > { %v696_v44 = vpop.f32.mrf.mxu0 }
 0x4b5   : > { %v697_v45 = vadd.f32 %v2805_v43, %v696_v44 }
 0x4b6   : > { %v3191_v46 = vpop.f32.mrf.mxu0 }
 0x4b7   : > { %v700_v47 = vsel %vm304_vm2, %v697_v45, -inf }
 0x4b8   : > { %701 = vmax.xlane.f32.xlu0 %v700_v47  ;;  %v2850_v47 = vld [vmem:[%s4395_s2 + $0x1b8] sm:$0xff] }
 0x541   : > { %v702_v48 = vpop.xlane.xlu0 %701 }
 0x542   : > { %v703_v49 = vsub.f32 %v697_v45, %v702_v48  ;;  %v2849_v48 = vld [vmem:[%s4395_s2 + $0x1b0] sm:$0xff] }
 0x544   : > { %v704_v50 = vmul.f32 1.442695, %v703_v49  ;;  %v2848_v49 = vld [vmem:[%s4395_s2 + $0x1a8] sm:$0xff] }
 0x546   : > { %3521 = vpow2.f32 %v704_v50  ;;  %v2847_v50 = vld [vmem:[%s4395_s2 + $0x1a0] sm:$0xff] }
 0x553   : > { %v3522_v51 = vpop.eup %3521 }
 0x554   : > { %v706_v52 = vsel %vm304_vm2, %v3522_v51, 0.0 }
 0x555   : > { %707 = vadd.xlane.f32.xlu0 %v706_v52  ;;  %v2845_v52 = vld [vmem:[%s4395_s2 + $0x190] sm:$0xff] }
 0x5de   : > { %v708_v61 = vpop.xlane.xlu0 %707 }
 0x5df   : > { %3523 = vrcp.f32 %v708_v61 }
 0x5ec   : > { %v3524_v0 = vpop.eup %3523 }
 0x5ed   : > { %v710_v2 = vmul.f32 %v3524_v0, %v3522_v51  ;;  %v2846_v51 = vld [vmem:[%s4395_s2 + $0x198] sm:$0xff]  ;;  %v2860_v0 = vld [vmem:[%s4395_s2 + $0x1e8] sm:$0xff] }
 0x5ef   : > { %v711_v3 = vsel %vm214_vm3, %v710_v2, %v697_v45  ;;  %v2859_v2 = vld [vmem:[%s4395_s2 + $0x1e0] sm:$0xff] }
 0x5f0   : > { %3209 = vmatmul.mubr.msk.f32.vlgmr.msra.gmra.mxu0 %vm224_vm1, %v711_v3  ;;  %v2858_v3 = vld [vmem:[%s4395_s2 + $0x1d8] sm:$0xff] }
 0x5f1   : > { %3213 = vmatprep.mubr.msk.f32.mxu0 %vm3605_vm0, %v3604_v1 }
 0x6b0   : > { %v792_v9 = vpop.f32.mrf.mxu0 }
 0x6b1   : > { %3212 = vmatpush3.msra.mxu0 %v792_v9 }
 0x6b2   : > { %v3210_v11 = vpop.f32.mrf.mxu0  ;;  %3214 = vmatmul.mubr.msk.f32.vlgmr.msra.gmra.mxu0 %vm304_vm2, %v3732_v10  ;;  %3235 = vmatprep.subr.mxu0 %v3604_v1 }
 0x6b3   : > { %3237 = vmatprep.mubr.msk.f32.mxu0 %vm3605_vm0, %v3604_v1 }
 0x772   : > { %v868_v16 = vpop.f32.mrf.mxu0 }
 0x773   : > { %v869_v17 = vadd.f32 %v2817_v15, %v868_v16  ;;  %v2873_v16 = vld [vmem:[%s4395_s2 + $0x230] sm:$0xff] }
 0x774   : > { %v3215_v18 = vpop.f32.mrf.mxu0 }
 0x775   : > { %v872_v19 = vmax.f32 %v869_v17, 0.0  ;;  %v2872_v17 = vld [vmem:[%s4395_s2 + $0x228] sm:$0xff]  ;;  %v2871_v18 = vld [vmem:[%s4395_s2 + $0x220] sm:$0xff] }
 0x777   : > { %3233 = vmatmul.mubr.msk.f32.vlgmr.msra.gmra.mxu1 %vm224_vm1, %v872_v19  ;;  %v2870_v19 = vld [vmem:[%s4395_s2 + $0x218] sm:$0xff] }
 0x778   : > { %3261 = vmatprep.mubr.msk.f32.mxu1 %vm3605_vm0, %v3604_v1 }
 0x837   : > { %v953_v20 = vpop.f32.mrf.mxu1 }
 0x838   : > { %3236 = vmatpush3.msra.mxu0 %v953_v20  ;;  %v2869_v20 = vld [vmem:[%s4395_s2 + $0x210] sm:$0xff] }
 0x839   : > { %v3234_v22 = vpop.f32.mrf.mxu1  ;;  %3238 = vmatmul.mubr.msk.f32.vlgmr.msra.gmra.mxu0 %vm304_vm2, %v3732_v10  ;;  %3240 = vmatprep.subr.mxu0 %v3604_v1 }
 0x83a   : > { %3241 = vmatpush3.msra.mxu0 %v2838_v21  ;;  %3256 = vmatprep.mubr.msk.f32.mxu0 %vm3605_vm0, %v3604_v1  ;;  %v2868_v21 = vld [vmem:[%s4395_s2 + $0x208] sm:$0xff]  ;;  %v2867_v22 = vld [vmem:[%s4395_s2 + $0x200] sm:$0xff] }
 0x83b   : > { %3242 = vmatprep.subr.mxu0 %v3604_v1 }
 0x83c   : > { %3243 = vmatpush3.msra.mxu0 %v2837_v23  ;;  %v2865_v23 = vld [vmem:[%s4396_s3 + $0x7] ss:$0 sm:$0xff] }
 0x83d   : > { %3244 = vmatprep.subr.mxu0 %v3604_v1 }
 0x83e   : > { %3245 = vmatpush3.msra.mxu0 %v2836_v24 }
 0x83f   : > { %3246 = vmatprep.subr.mxu0 %v3604_v1 }
 0x840   : > { %3247 = vmatpush3.msra.mxu0 %v2835_v25 }
 0x841   : > { %3248 = vmatprep.subr.mxu0 %v3604_v1 }
 0x842   : > { %3249 = vmatpush3.msra.mxu0 %v2834_v26 }
 0x843   : > { %3250 = vmatprep.subr.mxu0 %v3604_v1 }
 0x844   : > { %3251 = vmatpush3.msra.mxu0 %v2833_v27 }
 0x845   : > { %3252 = vmatprep.subr.mxu0 %v3604_v1 }
 0x846   : > { %3253 = vmatpush3.msra.mxu0 %v2832_v28 }
 0x847   : > { %3254 = vmatprep.subr.mxu0 %v3604_v1 }
 0x848   : > { %3255 = vmatpush3.msra.mxu0 %v2831_v29 }
 0x849   : > { %3283 = vmatprep.subr.mxu0 %v3604_v1 }
 0x8f9   : > { %v1029_v31 = vpop.f32.mrf.mxu0 }
 0x8fa   : > { %v1030_v32 = vadd.f32 %v2829_v30, %v1029_v31  ;;  %v2877_v30 = vld [vmem:[%s4396_s3 + $0x8] ss:$0 sm:$0xff] }
 0x8fb   : > { %v3239_v33 = vpop.f32.mrf.mxu0 }
 0x8fc   : > { %v1033_v34 = vmax.f32 %v1030_v32, 0.0 }
 0x8fe   : > { %3257 = vmatmul.mubr.msk.f32.vlgmr.msra.gmra.mxu0 %vm224_vm1, %v1033_v34 }
 0x8ff   : > { %3285 = vmatprep.mubr.msk.f32.mxu0 %vm3605_vm0, %v3604_v1 }
 0x9be   : > { %v1114_v35 = vpop.f32.mrf.mxu0 }
 0x9bf   : > { %3260 = vmatpush3.msra.mxu1 %v1114_v35 }
 0x9c0   : > { %v3258_v36 = vpop.f32.mrf.mxu0  ;;  %3262 = vmatmul.mubr.msk.f32.vlgmr.msra.gmra.mxu1 %vm304_vm2, %v3732_v10  ;;  %3264 = vmatprep.subr.mxu1 %v3604_v1 }
 0x9c1   : > { %3280 = vmatprep.mubr.msk.f32.mxu1 %vm3605_vm0, %v3604_v1  ;;  %3265 = vmatpush3.msra.mxu1 %v2850_v47  ;;  %v2879_v47 = vld [vmem:[%s4395_s2 + $0x240] sm:$0xff] }
 0x9c2   : > { %3266 = vmatprep.subr.mxu1 %v3604_v1 }
 0x9c3   : > { %3267 = vmatpush3.msra.mxu1 %v2849_v48 }
 0x9c4   : > { %3268 = vmatprep.subr.mxu1 %v3604_v1 }
 0x9c5   : > { %3269 = vmatpush3.msra.mxu1 %v2848_v49 }
 0x9c6   : > { %3270 = vmatprep.subr.mxu1 %v3604_v1 }
 0x9c7   : > { %3271 = vmatpush3.msra.mxu1 %v2847_v50 }
 0x9c8   : > { %3272 = vmatprep.subr.mxu1 %v3604_v1 }
 0x9c9   : > { %3273 = vmatpush3.msra.mxu1 %v2846_v51 }
 0x9ca   : > { %3274 = vmatprep.subr.mxu1 %v3604_v1 }
 0x9cb   : > { %3275 = vmatpush3.msra.mxu1 %v2845_v52 }
 0x9cc   : > { %3276 = vmatprep.subr.mxu1 %v3604_v1 }
 0x9cd   : > { %3277 = vmatpush3.msra.mxu1 %v2844_v53  ;;  %v2898_v53 = vld [vmem:[%s4395_s2 + $0x2b8] sm:$0xff] }
 0x9ce   : > { %3278 = vmatprep.subr.mxu1 %v3604_v1 }
 0x9cf   : > { %3279 = vmatpush3.msra.mxu1 %v2843_v54 }
 0x9d0   : > { %3307 = vmatprep.subr.mxu1 %v3604_v1 }
 0xa80   : > { %v1190_v38 = vpop.f32.mrf.mxu1 }
 0xa81   : > { %v1191_v39 = vadd.f32 %v2841_v37, %v1190_v38 }
 0xa82   : > { %v3263_v40 = vpop.f32.mrf.mxu1 }
 0xa83   : > { %v1194_v41 = vsel %vm304_vm2, %v1191_v39, -inf  ;;  %v2886_v40 = vld [vmem:[%s4395_s2 + $0x278] sm:$0xff] }
 0xa84   : > { %1195 = vmax.xlane.f32.xlu1 %v1194_v41  ;;  %v2885_v41 = vld [vmem:[%s4395_s2 + $0x270] sm:$0xff] }
 0xb0d   : > { %v1196_v42 = vpop.xlane.xlu1 %1195 }
 0xb0e   : > { %v1197_v43 = vsub.f32 %v1191_v39, %v1196_v42  ;;  %v2884_v42 = vld [vmem:[%s4395_s2 + $0x268] sm:$0xff] }
 0xb10   : > { %v1198_v44 = vmul.f32 1.442695, %v1197_v43  ;;  %v2883_v43 = vld [vmem:[%s4395_s2 + $0x260] sm:$0xff] }
 0xb12   : > { %3525 = vpow2.f32 %v1198_v44  ;;  %v2882_v44 = vld [vmem:[%s4395_s2 + $0x258] sm:$0xff] }
 0xb1f   : > { %v3526_v45 = vpop.eup %3525 }
 0xb20   : > { %v1200_v46 = vsel %vm304_vm2, %v3526_v45, 0.0 }
 0xb21   : > { %1201 = vadd.xlane.f32.xlu1 %v1200_v46  ;;  %v2880_v46 = vld [vmem:[%s4395_s2 + $0x248] sm:$0xff] }
 0xbaa   : > { %v1202_v55 = vpop.xlane.xlu1 %1201 }
 0xbab   : > { %3527 = vrcp.f32 %v1202_v55  ;;  %v2897_v55 = vld [vmem:[%s4395_s2 + $0x2b0] sm:$0xff] }
 0xbb8   : > { %v3528_v56 = vpop.eup %3527 }
 0xbb9   : > { %v1204_v57 = vmul.f32 %v3528_v56, %v3526_v45  ;;  %v2881_v45 = vld [vmem:[%s4395_s2 + $0x250] sm:$0xff]  ;;  %v2896_v56 = vld [vmem:[%s4395_s2 + $0x2a8] sm:$0xff] }
 0xbbb   : > { %v1205_v58 = vsel %vm214_vm3, %v1204_v57, %v1191_v39  ;;  %v2895_v57 = vld [vmem:[%s4395_s2 + $0x2a0] sm:$0xff] }
 0xbbc   : > { %3281 = vmatmul.mubr.msk.f32.vlgmr.msra.gmra.mxu1 %vm224_vm1, %v1205_v58  ;;  %v2894_v58 = vld [vmem:[%s4395_s2 + $0x298] sm:$0xff] }
 0xbbd   : > { %3309 = vmatprep.mubr.msk.f32.mxu1 %vm3605_vm0, %v3604_v1 }
 0xc7c   : > { %v1286_v59 = vpop.f32.mrf.mxu1 }
 0xc7d   : > { %3284 = vmatpush3.msra.mxu0 %v1286_v59  ;;  %v2893_v59 = vld [vmem:[%s4395_s2 + $0x290] sm:$0xff] }
 0xc7e   : > { %v3282_v61 = vpop.f32.mrf.mxu1  ;;  %3286 = vmatmul.mubr.msk.f32.vlgmr.msra.gmra.mxu0 %vm304_vm2, %v3732_v10  ;;  %3288 = vmatprep.subr.mxu0 %v3604_v1 }
 0xc7f   : > { %3289 = vmatpush3.msra.mxu0 %v2862_v60  ;;  %3304 = vmatprep.mubr.msk.f32.mxu0 %vm3605_vm0, %v3604_v1  ;;  %v2892_v60 = vld [vmem:[%s4395_s2 + $0x288] sm:$0xff]  ;;  %v2891_v61 = vld [vmem:[%s4395_s2 + $0x280] sm:$0xff] }
 0xc80   : > { %3290 = vmatprep.subr.mxu0 %v3604_v1 }
 0xc81   : > { %3291 = vmatpush3.msra.mxu0 %v2861_v62  ;;  %v2889_v62 = vld [vmem:[%s4396_s3 + $0x9] ss:$0 sm:$0xff] }
 0xc82   : > { %3292 = vmatprep.subr.mxu0 %v3604_v1 }
 0xc83   : > { %3293 = vmatpush3.msra.mxu0 %v2860_v0 }
 0xc84   : > { %3294 = vmatprep.subr.mxu0 %v3604_v1 }
 0xc85   : > { %3295 = vmatpush3.msra.mxu0 %v2859_v2 }
 0xc86   : > { %3296 = vmatprep.subr.mxu0 %v3604_v1 }
 0xc87   : > { %3297 = vmatpush3.msra.mxu0 %v2858_v3 }
 0xc88   : > { %3298 = vmatprep.subr.mxu0 %v3604_v1 }
 0xc89   : > { %3299 = vmatpush3.msra.mxu0 %v2857_v4 }
 0xc8a   : > { %3300 = vmatprep.subr.mxu0 %v3604_v1 }
 0xc8b   : > { %3301 = vmatpush3.msra.mxu0 %v2856_v5 }
 0xc8c   : > { %3302 = vmatprep.subr.mxu0 %v3604_v1 }
 0xc8d   : > { %3303 = vmatpush3.msra.mxu0 %v2855_v6  ;;  %v2910_v6 = vld [vmem:[%s4395_s2 + $0x2f8] sm:$0xff] }
 0xc8e   : > { %3331 = vmatprep.subr.mxu0 %v3604_v1 }
 0xd3e   : > { %v1362_v8 = vpop.f32.mrf.mxu0 }
 0xd3f   : > { %v1363_v9 = vadd.f32 %v2853_v7, %v1362_v8  ;;  %v2909_v8 = vld [vmem:[%s4395_s2 + $0x2f0] sm:$0xff] }
 0xd40   : > { %v3287_v11 = vpop.f32.mrf.mxu0 }
 0xd41   : > { %v1366_v12 = vmax.f32 %v1363_v9, 0.0  ;;  %v2908_v9 = vld [vmem:[%s4395_s2 + $0x2e8] sm:$0xff]  ;;  %v2907_v11 = vld [vmem:[%s4395_s2 + $0x2e0] sm:$0xff] }
 0xd43   : > { %3305 = vmatmul.mubr.msk.f32.vlgmr.msra.gmra.mxu0 %vm224_vm1, %v1366_v12  ;;  %v2906_v12 = vld [vmem:[%s4395_s2 + $0x2d8] sm:$0xff] }
 0xd44   : > { %3333 = vmatprep.mubr.msk.f32.mxu0 %vm3605_vm0, %v3604_v1 }
 0xe03   : > { %v1447_v13 = vpop.f32.mrf.mxu0 }
 0xe04   : > { %3308 = vmatpush3.msra.mxu1 %v1447_v13  ;;  %v2905_v13 = vld [vmem:[%s4395_s2 + $0x2d0] sm:$0xff] }
 0xe05   : > { %v3306_v15 = vpop.f32.mrf.mxu0  ;;  %3310 = vmatmul.mubr.msk.f32.vlgmr.msra.gmra.mxu1 %vm304_vm2, %v3732_v10  ;;  %3312 = vmatprep.subr.mxu1 %v3604_v1 }
 0xe06   : > { %3313 = vmatpush3.msra.mxu1 %v2874_v14  ;;  %3328 = vmatprep.mubr.msk.f32.mxu1 %vm3605_vm0, %v3604_v1  ;;  %v2904_v14 = vld [vmem:[%s4395_s2 + $0x2c8] sm:$0xff]  ;;  %v2903_v15 = vld [vmem:[%s4395_s2 + $0x2c0] sm:$0xff] }
 0xe07   : > { %3314 = vmatprep.subr.mxu1 %v3604_v1 }
 0xe08   : > { %3315 = vmatpush3.msra.mxu1 %v2873_v16  ;;  %v2901_v16 = vld [vmem:[%s4396_s3 + $0xa] ss:$0 sm:$0xff] }
 0xe09   : > { %3316 = vmatprep.subr.mxu1 %v3604_v1 }
 0xe0a   : > { %3317 = vmatpush3.msra.mxu1 %v2872_v17 }
 0xe0b   : > { %3318 = vmatprep.subr.mxu1 %v3604_v1 }
 0xe0c   : > { %3319 = vmatpush3.msra.mxu1 %v2871_v18 }
 0xe0d   : > { %3320 = vmatprep.subr.mxu1 %v3604_v1 }
 0xe0e   : > { %3321 = vmatpush3.msra.mxu1 %v2870_v19 }
 0xe0f   : > { %3322 = vmatprep.subr.mxu1 %v3604_v1 }
 0xe10   : > { %3323 = vmatpush3.msra.mxu1 %v2869_v20 }
 0xe11   : > { %3324 = vmatprep.subr.mxu1 %v3604_v1 }
 0xe12   : > { %3325 = vmatpush3.msra.mxu1 %v2868_v21 }
 0xe13   : > { %3326 = vmatprep.subr.mxu1 %v3604_v1 }
 0xe14   : > { %3327 = vmatpush3.msra.mxu1 %v2867_v22 }
 0xe15   : > { %3355 = vmatprep.subr.mxu1 %v3604_v1 }
 0xec5   : > { %v1523_v24 = vpop.f32.mrf.mxu1 }
 0xec6   : > { %v1524_v25 = vadd.f32 %v2865_v23, %v1523_v24  ;;  %v2913_v23 = vld [vmem:[%s4396_s3 + $0xb] ss:$0 sm:$0xff] }
 0xec7   : > { %v3311_v26 = vpop.f32.mrf.mxu1 }
 0xec8   : > { %v1527_v27 = vmax.f32 %v1524_v25, 0.0 }
 0xeca   : > { %3329 = vmatmul.mubr.msk.f32.vlgmr.msra.gmra.mxu1 %vm224_vm1, %v1527_v27 }
 0xecb   : > { %3357 = vmatprep.mubr.msk.f32.mxu1 %vm3605_vm0, %v3604_v1 }
 0xf8a   : > { %v1608_v28 = vpop.f32.mrf.mxu1 }
 0xf8b   : > { %3332 = vmatpush3.msra.mxu0 %v1608_v28 }
 0xf8c   : > { %v3330_v29 = vpop.f32.mrf.mxu1  ;;  %3334 = vmatmul.mubr.msk.f32.vlgmr.msra.gmra.mxu0 %vm304_vm2, %v3732_v10  ;;  %3336 = vmatprep.subr.mxu0 %v3604_v1 }
 0xf8d   : > { %3352 = vmatprep.mubr.msk.f32.mxu0 %vm3605_vm0, %v3604_v1  ;;  %3337 = vmatpush3.msra.mxu0 %v2886_v40  ;;  %v2915_v40 = vld [vmem:[%s4395_s2 + $0x300] sm:$0xff] }
 0xf8e   : > { %3338 = vmatprep.subr.mxu0 %v3604_v1 }
 0xf8f   : > { %3339 = vmatpush3.msra.mxu0 %v2885_v41 }
 0xf90   : > { %3340 = vmatprep.subr.mxu0 %v3604_v1 }
 0xf91   : > { %3341 = vmatpush3.msra.mxu0 %v2884_v42 }
 0xf92   : > { %3342 = vmatprep.subr.mxu0 %v3604_v1 }
 0xf93   : > { %3343 = vmatpush3.msra.mxu0 %v2883_v43 }
 0xf94   : > { %3344 = vmatprep.subr.mxu0 %v3604_v1 }
 0xf95   : > { %3345 = vmatpush3.msra.mxu0 %v2882_v44 }
 0xf96   : > { %3346 = vmatprep.subr.mxu0 %v3604_v1 }
 0xf97   : > { %3347 = vmatpush3.msra.mxu0 %v2881_v45 }
 0xf98   : > { %3348 = vmatprep.subr.mxu0 %v3604_v1 }
 0xf99   : > { %3349 = vmatpush3.msra.mxu0 %v2880_v46  ;;  %v2934_v46 = vld [vmem:[%s4395_s2 + $0x378] sm:$0xff] }
 0xf9a   : > { %3350 = vmatprep.subr.mxu0 %v3604_v1 }
 0xf9b   : > { %3351 = vmatpush3.msra.mxu0 %v2879_v47 }
 0xf9c   : > { %3379 = vmatprep.subr.mxu0 %v3604_v1 }
0x104c   : > { %v1684_v31 = vpop.f32.mrf.mxu0 }
0x104d   : > { %v1685_v32 = vadd.f32 %v2877_v30, %v1684_v31 }
0x104e   : > { %v3335_v33 = vpop.f32.mrf.mxu0 }
0x104f   : > { %v1688_v34 = vsel %vm304_vm2, %v1685_v32, -inf  ;;  %v2922_v33 = vld [vmem:[%s4395_s2 + $0x338] sm:$0xff] }
0x1050   : > { %1689 = vmax.xlane.f32.xlu0 %v1688_v34  ;;  %v2921_v34 = vld [vmem:[%s4395_s2 + $0x330] sm:$0xff] }
0x10d9   : > { %v1690_v35 = vpop.xlane.xlu0 %1689 }
0x10da   : > { %v1691_v36 = vsub.f32 %v1685_v32, %v1690_v35  ;;  %v2920_v35 = vld [vmem:[%s4395_s2 + $0x328] sm:$0xff] }
0x10dc   : > { %v1692_v37 = vmul.f32 1.442695, %v1691_v36  ;;  %v2919_v36 = vld [vmem:[%s4395_s2 + $0x320] sm:$0xff] }
0x10de   : > { %3529 = vpow2.f32 %v1692_v37  ;;  %v2918_v37 = vld [vmem:[%s4395_s2 + $0x318] sm:$0xff] }
0x10eb   : > { %v3530_v38 = vpop.eup %3529 }
0x10ec   : > { %v1694_v39 = vsel %vm304_vm2, %v3530_v38, 0.0 }
0x10ed   : > { %1695 = vadd.xlane.f32.xlu1 %v1694_v39  ;;  %v2916_v39 = vld [vmem:[%s4395_s2 + $0x308] sm:$0xff] }
0x1176   : > { %v1696_v48 = vpop.xlane.xlu1 %1695 }
0x1177   : > { %3531 = vrcp.f32 %v1696_v48  ;;  %v2932_v48 = vld [vmem:[%s4395_s2 + $0x368] sm:$0xff] }
0x1184   : > { %v3532_v49 = vpop.eup %3531 }
0x1185   : > { %v1698_v50 = vmul.f32 %v3532_v49, %v3530_v38  ;;  %v2917_v38 = vld [vmem:[%s4395_s2 + $0x310] sm:$0xff]  ;;  %v2930_v49 = vld [vmem:[%s4395_s2 + $0x358] sm:$0xff] }
0x1187   : > { %v1699_v51 = vsel %vm214_vm3, %v1698_v50, %v1685_v32  ;;  %v2929_v50 = vld [vmem:[%s4395_s2 + $0x350] sm:$0xff] }
0x1188   : > { %3353 = vmatmul.mubr.msk.f32.vlgmr.msra.gmra.mxu0 %vm224_vm1, %v1699_v51  ;;  %v2928_v51 = vld [vmem:[%s4395_s2 + $0x348] sm:$0xff] }
0x1189   : > { %3381 = vmatprep.mubr.msk.f32.mxu0 %vm3605_vm0, %v3604_v1 }
0x1248   : > { %v1780_v52 = vpop.f32.mrf.mxu0 }
0x1249   : > { %3356 = vmatpush3.msra.mxu1 %v1780_v52  ;;  %v2927_v52 = vld [vmem:[%s4395_s2 + $0x340] sm:$0xff] }
0x124a   : > { %v3354_v54 = vpop.f32.mrf.mxu0  ;;  %3358 = vmatmul.mubr.msk.f32.vlgmr.msra.gmra.mxu1 %vm304_vm2, %v3732_v10  ;;  %3360 = vmatprep.subr.mxu1 %v3604_v1 }
0x124b   : > { %3361 = vmatpush3.msra.mxu1 %v2898_v53  ;;  %3376 = vmatprep.mubr.msk.f32.mxu1 %vm3605_vm0, %v3604_v1  ;;  %v2925_v53 = vld [vmem:[%s4396_s3 + $0xc] ss:$0 sm:$0xff] }
0x124c   : > { %3362 = vmatprep.subr.mxu1 %v3604_v1 }
0x124d   : > { %3363 = vmatpush3.msra.mxu1 %v2897_v55 }
0x124e   : > { %3364 = vmatprep.subr.mxu1 %v3604_v1 }
0x124f   : > { %3365 = vmatpush3.msra.mxu1 %v2896_v56 }
0x1250   : > { %3366 = vmatprep.subr.mxu1 %v3604_v1 }
0x1251   : > { %3367 = vmatpush3.msra.mxu1 %v2895_v57 }
0x1252   : > { %3368 = vmatprep.subr.mxu1 %v3604_v1 }
0x1253   : > { %3369 = vmatpush3.msra.mxu1 %v2894_v58 }
0x1254   : > { %3370 = vmatprep.subr.mxu1 %v3604_v1 }
0x1255   : > { %3371 = vmatpush3.msra.mxu1 %v2893_v59  ;;  %v2946_v59 = vld [vmem:[%s4395_s2 + $0x3b8] sm:$0xff] }
0x1256   : > { %3372 = vmatprep.subr.mxu1 %v3604_v1 }
0x1257   : > { %3373 = vmatpush3.msra.mxu1 %v2892_v60 }
0x1258   : > { %3374 = vmatprep.subr.mxu1 %v3604_v1 }
0x1259   : > { %3375 = vmatpush3.msra.mxu1 %v2891_v61  ;;  %v3541_v61 = vld [vmem:[%s3729_s7] sm:$0xff]  ;;  %s201_s7 = scalar_lea.vmem [#allocation2], %s2777_s5 }
0x125a   : > { %3403 = vmatprep.subr.mxu1 %v3604_v1  ;;  %s2702_s8 = sshll.u32 %s201_s7, 4  ;;  %s2703_s8 = int_to_ptr.vmem [resolvable:$true] %s2702_s8 }
0x125b   : > { %s3542_s13 = scalar_lea.vmem %s2703_s8, 128  ;;  %p3549_p0 = scmp.lt.s32.totalorder %s2703_s8, %s3547_s20 }
0x125c   : > { %p3543_p11 = scmp.ne.s32.totalorder %s2703_s8, %s3542_s13  ;;  %p3550_p1 = scmp.lt.s32.totalorder %s3548_s19, %s3542_s13 }
0x125e   : > { %p3544_p12 = pnand %p3543_p11, %p3670_p5  ;;  %p3551_p2 = por %p3550_p1, %p3549_p0 }
0x1260   : > { %p3545_p13 = pneg %p3544_p12 }
0x1262   : > { %p3552_p3 = pnand %p3551_p2, %p3545_p13 }
0x130a   : > { %v1856_v0 = vpop.f32.mrf.mxu1 }
0x130b   : > { %v1857_v2 = vadd.f32 %v2889_v62, %v1856_v0  ;;  %v2945_v62 = vld [vmem:[%s4395_s2 + $0x3b0] sm:$0xff]  ;;  %v2944_v0 = vld [vmem:[%s4395_s2 + $0x3a8] sm:$0xff] }
0x130c   : > { %v3359_v3 = vpop.f32.mrf.mxu1 }
0x130d   : > { %v1860_v4 = vmax.f32 %v1857_v2, 0.0  ;;  %v2943_v2 = vld [vmem:[%s4395_s2 + $0x3a0] sm:$0xff]  ;;  %v2942_v3 = vld [vmem:[%s4395_s2 + $0x398] sm:$0xff] }
0x130f   : > { %3377 = vmatmul.mubr.msk.f32.vlgmr.msra.gmra.mxu1 %vm224_vm1, %v1860_v4  ;;  %v2941_v4 = vld [vmem:[%s4395_s2 + $0x390] sm:$0xff] }
0x1310   : > { %3405 = vmatprep.mubr.msk.f32.mxu1 %vm3605_vm0, %v3604_v1 }
0x13cf   : > { %v1941_v5 = vpop.f32.mrf.mxu1 }
0x13d0   : > { %3380 = vmatpush3.msra.mxu0 %v1941_v5  ;;  %v2940_v5 = vld [vmem:[%s4395_s2 + $0x388] sm:$0xff] }
0x13d1   : > { %v3378_v7 = vpop.f32.mrf.mxu1  ;;  %3382 = vmatmul.mubr.msk.f32.vlgmr.msra.gmra.mxu0 %vm304_vm2, %v3732_v10  ;;  %3384 = vmatprep.subr.mxu0 %v3604_v1 }
0x13d2   : > { %3385 = vmatpush3.msra.mxu0 %v2910_v6  ;;  %3400 = vmatprep.mubr.msk.f32.mxu0 %vm3605_vm0, %v3604_v1  ;;  %v2939_v6 = vld [vmem:[%s4395_s2 + $0x380] sm:$0xff]  ;;  %v2937_v7 = vld [vmem:[%s4396_s3 + $0xd] ss:$0 sm:$0xff] }
0x13d3   : > { %3386 = vmatprep.subr.mxu0 %v3604_v1 }
0x13d4   : > { %3387 = vmatpush3.msra.mxu0 %v2909_v8 }
0x13d5   : > { %3388 = vmatprep.subr.mxu0 %v3604_v1 }
0x13d6   : > { %3389 = vmatpush3.msra.mxu0 %v2908_v9 }
0x13d7   : > { %3390 = vmatprep.subr.mxu0 %v3604_v1 }
0x13d8   : > { %3391 = vmatpush3.msra.mxu0 %v2907_v11 }
0x13d9   : > { %3392 = vmatprep.subr.mxu0 %v3604_v1 }
0x13da   : > { %3393 = vmatpush3.msra.mxu0 %v2906_v12 }
0x13db   : > { %3394 = vmatprep.subr.mxu0 %v3604_v1 }
0x13dc   : > { %3395 = vmatpush3.msra.mxu0 %v2905_v13 }
0x13dd   : > { %3396 = vmatprep.subr.mxu0 %v3604_v1 }
0x13de   : > { %3397 = vmatpush3.msra.mxu0 %v2904_v14 }
0x13df   : > { %3398 = vmatprep.subr.mxu0 %v3604_v1 }
0x13e0   : > { %3399 = vmatpush3.msra.mxu0 %v2903_v15 }
0x13e1   : > { %3427 = vmatprep.subr.mxu0 %v3604_v1 }
0x1491   : > { %v2017_v17 = vpop.f32.mrf.mxu0 }
0x1492   : > { %v2018_v18 = vadd.f32 %v2901_v16, %v2017_v17 }
0x1493   : > { %v3383_v19 = vpop.f32.mrf.mxu0 }
0x1494   : > { %v2021_v20 = vmax.f32 %v2018_v18, 0.0 }
0x1496   : > { %3401 = vmatmul.mubr.msk.f32.vlgmr.msra.gmra.mxu0 %vm224_vm1, %v2021_v20 }
0x1497   : > { %3429 = vmatprep.mubr.msk.f32.mxu0 %vm3605_vm0, %v3604_v1 }
0x1556   : > { %v2102_v21 = vpop.f32.mrf.mxu0 }
0x1557   : > { %3404 = vmatpush3.msra.mxu1 %v2102_v21 }
0x1558   : > { %v3402_v22 = vpop.f32.mrf.mxu0  ;;  %3406 = vmatmul.mubr.msk.f32.vlgmr.msra.gmra.mxu1 %vm304_vm2, %v3732_v10  ;;  %3408 = vmatprep.subr.mxu1 %v3604_v1 }
0x1559   : > { %3424 = vmatprep.mubr.msk.f32.mxu1 %vm3605_vm0, %v3604_v1  ;;  %3409 = vmatpush3.msra.mxu1 %v2922_v33 }
0x155a   : > { %3410 = vmatprep.subr.mxu1 %v3604_v1 }
0x155b   : > { %3411 = vmatpush3.msra.mxu1 %v2921_v34 }
0x155c   : > { %3412 = vmatprep.subr.mxu1 %v3604_v1 }
0x155d   : > { %3413 = vmatpush3.msra.mxu1 %v2920_v35 }
0x155e   : > { %3414 = vmatprep.subr.mxu1 %v3604_v1 }
0x155f   : > { %3415 = vmatpush3.msra.mxu1 %v2919_v36 }
0x1560   : > { %3416 = vmatprep.subr.mxu1 %v3604_v1 }
0x1561   : > { %3417 = vmatpush3.msra.mxu1 %v2918_v37 }
0x1562   : > { %3418 = vmatprep.subr.mxu1 %v3604_v1 }
0x1563   : > { %3419 = vmatpush3.msra.mxu1 %v2917_v38 }
0x1564   : > { %3420 = vmatprep.subr.mxu1 %v3604_v1 }
0x1565   : > { %3421 = vmatpush3.msra.mxu1 %v2916_v39 }
0x1566   : > { %3422 = vmatprep.subr.mxu1 %v3604_v1 }
0x1567   : > { %3423 = vmatpush3.msra.mxu1 %v2915_v40 }
0x1568   : > { %3451 = vmatprep.subr.mxu1 %v3604_v1 }
0x1618   : > { %v2178_v24 = vpop.f32.mrf.mxu1 }
0x1619   : > { %v2179_v25 = vadd.f32 %v2913_v23, %v2178_v24 }
0x161a   : > { %v3407_v26 = vpop.f32.mrf.mxu1 }
0x161b   : > { %v2182_v27 = vsel %vm304_vm2, %v2179_v25, -inf }
0x161c   : > { %2183 = vmax.xlane.f32.xlu0 %v2182_v27 }
0x16a5   : > { %v2184_v28 = vpop.xlane.xlu0 %2183 }
0x16a6   : > { %v2185_v29 = vsub.f32 %v2179_v25, %v2184_v28 }
0x16a8   : > { %v2186_v30 = vmul.f32 1.442695, %v2185_v29 }
0x16aa   : > { %3533 = vpow2.f32 %v2186_v30 }
0x16b7   : > { %v3534_v31 = vpop.eup %3533 }
0x16b8   : > { %v2188_v32 = vsel %vm304_vm2, %v3534_v31, 0.0 }
0x16b9   : > { %2189 = vadd.xlane.f32.xlu1 %v2188_v32 }
0x1742   : > { %v2190_v41 = vpop.xlane.xlu1 %2189 }
0x1743   : > { %3535 = vrcp.f32 %v2190_v41 }
0x1750   : > { %v3536_v42 = vpop.eup %3535 }
0x1751   : > { %v2192_v43 = vmul.f32 %v3536_v42, %v3534_v31 }
0x1753   : > { %v2193_v44 = vsel %vm214_vm3, %v2192_v43, %v2179_v25 }
0x1754   : > { %3425 = vmatmul.mubr.msk.f32.vlgmr.msra.gmra.mxu1 %vm224_vm1, %v2193_v44 }
0x1755   : > { %3453 = vmatprep.mubr.msk.f32.mxu1 %vm3605_vm0, %v3604_v1 }
0x1814   : > { %v2274_v45 = vpop.f32.mrf.mxu1 }
0x1815   : > { %3428 = vmatpush3.msra.mxu0 %v2274_v45 }
0x1816   : > { %v3426_v47 = vpop.f32.mrf.mxu1  ;;  %3430 = vmatmul.mubr.msk.f32.vlgmr.msra.gmra.mxu0 %vm304_vm2, %v3732_v10  ;;  %3432 = vmatprep.subr.mxu0 %v3604_v1  ;;  %v2931_v10 = vld [vmem:[%s4395_s2 + $0x360] sm:$0xff] }
0x1817   : > { %3433 = vmatpush3.msra.mxu0 %v2934_v46  ;;  %3448 = vmatprep.mubr.msk.f32.mxu0 %vm3605_vm0, %v3604_v1 }
0x1818   : > { %3434 = vmatprep.subr.mxu0 %v3604_v1 }
0x1819   : > { %3435 = vmatpush3.msra.mxu0 %v2933_v63 }
0x181a   : > { %3436 = vmatprep.subr.mxu0 %v3604_v1 }
0x181b   : > { %3437 = vmatpush3.msra.mxu0 %v2932_v48 }
0x181c   : > { %3438 = vmatprep.subr.mxu0 %v3604_v1 }
0x181d   : > { %3439 = vmatpush3.msra.mxu0 %v2931_v10 }
0x181e   : > { %3440 = vmatprep.subr.mxu0 %v3604_v1 }
0x181f   : > { %3441 = vmatpush3.msra.mxu0 %v2930_v49 }
0x1820   : > { %3442 = vmatprep.subr.mxu0 %v3604_v1 }
0x1821   : > { %3443 = vmatpush3.msra.mxu0 %v2929_v50 }
0x1822   : > { %3444 = vmatprep.subr.mxu0 %v3604_v1 }
0x1823   : > { %3445 = vmatpush3.msra.mxu0 %v2928_v51 }
0x1824   : > { %3446 = vmatprep.subr.mxu0 %v3604_v1 }
0x1825   : > { %3447 = vmatpush3.msra.mxu0 %v2927_v52 }
0x1826   : > { %3475 = vmatprep.subr.mxu0 %v3604_v1 }
0x18d6   : > { %v2350_v54 = vpop.f32.mrf.mxu0 }
0x18d7   : > { %v2351_v55 = vadd.f32 %v2925_v53, %v2350_v54 }
0x18d8   : > { %v3431_v56 = vpop.f32.mrf.mxu0 }
0x18d9   : > { %v2354_v57 = vmax.f32 %v2351_v55, 0.0 }
0x18db   : > { %3449 = vmatmul.mubr.msk.f32.vlgmr.msra.gmra.mxu0 %vm224_vm1, %v2354_v57 }
0x18dc   : > { %3477 = vmatprep.mubr.msk.f32.mxu0 %vm3605_vm0, %v3604_v1 }
0x199b   : > { %v2435_v58 = vpop.f32.mrf.mxu0 }
0x199c   : > { %3452 = vmatpush3.msra.mxu1 %v2435_v58 }
0x199d   : > { %v3450_v60 = vpop.f32.mrf.mxu0  ;;  %3454 = vmatmul.mubr.msk.f32.vlgmr.msra.gmra.mxu1 %vm304_vm2, %v3541_v61  ;;  %3456 = vmatprep.subr.mxu1 %v3604_v1 }
0x199e   : > { %3457 = vmatpush3.msra.mxu1 %v2946_v59  ;;  %3472 = vmatprep.mubr.msk.f32.mxu1 %vm3605_vm0, %v3604_v1 }
0x199f   : > { %3458 = vmatprep.subr.mxu1 %v3604_v1 }
0x19a0   : > { %3459 = vmatpush3.msra.mxu1 %v2945_v62 }
0x19a1   : > { %3460 = vmatprep.subr.mxu1 %v3604_v1 }
0x19a2   : > { %3461 = vmatpush3.msra.mxu1 %v2944_v0 }
0x19a3   : > { %3462 = vmatprep.subr.mxu1 %v3604_v1 }
0x19a4   : > { %3463 = vmatpush3.msra.mxu1 %v2943_v2 }
0x19a5   : > { %3464 = vmatprep.subr.mxu1 %v3604_v1 }
0x19a6   : > { %3465 = vmatpush3.msra.mxu1 %v2942_v3 }
0x19a7   : > { %3466 = vmatprep.subr.mxu1 %v3604_v1 }
0x19a8   : > { %3467 = vmatpush3.msra.mxu1 %v2941_v4 }
0x19a9   : > { %3468 = vmatprep.subr.mxu1 %v3604_v1 }
0x19aa   : > { %3469 = vmatpush3.msra.mxu1 %v2940_v5 }
0x19ab   : > { %3470 = vmatprep.subr.mxu1 %v3604_v1  ;;  %v2949_v1 = vld [vmem:[%s4396_s3 + $0xe] ss:$0 sm:$0xff] }
0x19ac   : > { %3471 = vmatpush3.msra.mxu1 %v2939_v6 }
0x1a5d   : > { %v2511_v8 = vpop.f32.mrf.mxu1 }
0x1a5e   : > { %v2512_v9 = vadd.f32 %v2937_v7, %v2511_v8 }
0x1a5f   : > { %v3455_v11 = vpop.f32.mrf.mxu1 }
0x1a60   : > { %v2515_v12 = vmax.f32 %v2512_v9, 0.0 }
0x1a62   : > { %3473 = vmatmul.mubr.msk.f32.vlgmr.msra.gmra.mxu1 %vm224_vm1, %v2515_v12 }
0x1b22   : > { %v2596_v13 = vpop.f32.mrf.mxu1 }
0x1b23   : > { %3476 = vmatpush3.msra.mxu0 %v2596_v13 }
0x1b24   : > { %v3474_v14 = vpop.f32.mrf.mxu1  ;;  %3478 = vmatmul.mubr.msk.f32.vlgmr.msra.gmra.mxu0 %vm304_vm2, %v3541_v61 }
0x1be4   : > { %v2672_v15 = vpop.f32.mrf.mxu0 }
0x1be5   : > { %v2673_v16 = vadd.f32 %v2949_v1, %v2672_v15 }
0x1be6   : > { %v3479_v17 = vpop.f32.mrf.mxu0 }
0x1be7   : > { %v2676_v18 = vsel %vm304_vm2, %v2673_v16, -inf }
0x1be8   : > { %2677 = vmax.xlane.f32.xlu0 %v2676_v18 }
0x1c71   : > { %v2678_v19 = vpop.xlane.xlu0 %2677 }
0x1c72   : > { %v2679_v20 = vsub.f32 %v2673_v16, %v2678_v19 }
0x1c74   : > { %v2680_v21 = vmul.f32 1.442695, %v2679_v20 }
0x1c76   : > { %3537 = vpow2.f32 %v2680_v21 }
0x1c83   : > { %v3538_v22 = vpop.eup %3537 }
0x1c84   : > { %v2682_v23 = vsel %vm304_vm2, %v3538_v22, 0.0 }
0x1c85   : > { %2683 = vadd.xlane.f32.xlu1 %v2682_v23 }
0x1d0e   : > { %v2684_v24 = vpop.xlane.xlu1 %2683 }
0x1d0f   : > { %3539 = vrcp.f32 %v2684_v24 }
0x1d1c   : > { %v3540_v25 = vpop.eup %3539 }
0x1d1d   : > { %v2686_v26 = vmul.f32 %v3540_v25, %v3538_v22 }
0x1d1f   : > { %2687 = vst.msk [vmem:[%s201_s7] sm:$0xff] %vm304_vm2, %v2686_v26 }
0x1d20   : > { %3555 = shalt.err (!%p3552_p3)
}
0x1d21   : > { %s3556_s22 = scalar_lea.hbm %s2700_s11, 128  ;;  %s3560_s28 = scalar_lea.hbm %s4397_s4, 256 }
0x1d22   : > { %p3557_p4 = scmp.ne.s32.totalorder %s2700_s11, %s3556_s22  ;;  %p3561_p9 = scmp.lt.s32.totalorder %s2700_s11, %s4397_s4 }
0x1d23   : > { %p3562_p10 = scmp.lt.s32.totalorder %s3560_s28, %s3556_s22 }
0x1d24   : > { %p3558_p7 = pnand %p3557_p4, %p3670_p5 }
0x1d25   : > { %p3563_p11 = por %p3562_p10, %p3561_p9 }
0x1d26   : > { %p3559_p8 = pneg %p3558_p7 }
0x1d28   : > { %p3564_p12 = pnand %p3563_p11, %p3559_p8 }
0x1d2a   : > { %3567 = shalt.err (!%p3564_p12)
}
0x1d2b   : > { %3480 = dma.vmem_to_hbm [thread:$0]  (%p3670_p5), %s2703_s8, 128, %s2700_s11, %s2689_s12  }
0x1d2c PF: > { %p3486_p13 = scmp.ge.s32.totalorder %s3602_s18, 2  ;;  %s2714_s5 = sand.u32 1, %s3590_s15  }
0x1d2d   : > { %s2715_s6 = scalar_lea.sflag [#allocation3], %s2714_s5 }
0x1d2e   : > { %p3483_p0 = pnand %p3486_p13, %p3674_p6 }
0x1d30   : > { %p3484_p1 = pneg %p3483_p0 }
0x1d32   : > { %3585 = dma.done.wait (%p3484_p1), %s2715_s6, 128  }
0x1d33   : > { %3587 = vsyncadd (%p3484_p1), %s2715_s6, 4294967168  ;;  %p14_p2 = scmp.ge.s32.totalorder %s3657_s21, 4   ;;  %s4400_s15 = smov %s3594_s16 }
0x1d34   : > { %s4401_s16 = smov %s3598_s17  ;;  %s4402_s17 = smov %s3668_s24 }
0x1d35   : > { %s4403_s18 = smov %s3657_s21  ;;  %16 = sbr.rel (!%p14_p2) target bundleno = 3 (0x3), region = 102 }
0x1d3a   :  { %2720 = vsyncpa [#allocation3], 1 }
0x1d3b   :  { %2722 = vsyncpa [#allocation3 + $0x1], 1 }

</bundles_post_ra>
